<compile_context>
chip_gen: v6e
topology: v6e:2x2x1
jax: 0.10.0
libtpu: 0.0.40
codegen_flags: <defaults>
</compile_context>

<pallas_src>
import functools

import jax
import jax.numpy as jnp
from jax.experimental import pallas as pl
from jax.experimental.pallas import tpu as pltpu


# ------------------------------ in-kernel math ------------------------------ #

def _layernorm(z, gamma, beta, eps):
    """LayerNorm over the last (feature / lane) axis. gamma/beta are (1, D)."""
    mu = jnp.mean(z, axis=-1, keepdims=True)
    var = jnp.mean(jnp.square(z - mu), axis=-1, keepdims=True)
    return (z - mu) * jax.lax.rsqrt(var + eps) * gamma + beta


def _encoder_kernel(x_ref, in_w_ref, in_b_ref,          # input projection
                    wqkv_ref, wo_ref,                    # fused QKV + out proj
                    ga_ref, ba_ref,                      # attn-internal LN (1e-6)
                    g1_ref, b1_ref,                      # residual LN1 (1e-5)
                    w1_ref, fb1_ref, w2_ref, fb2_ref,    # FFN
                    g2_ref, b2_ref,                      # residual LN2 (1e-5)
                    gf_ref, bf_ref,                      # final encoder LN (1e-5)
                    o_ref,                               # output
                    h_sc,                                # VMEM carry (S, d_model)
                    *, n_heads, d_k, d_v, scale):
    l = pl.program_id(1)
    n_layers = pl.num_programs(1)

    # ---- layer 0: input projection (Linear with bias) into the VMEM carry ----
    @pl.when(l == 0)
    def _():
        x = x_ref[0]                                            # (S, in_dim)
        h_sc[...] = (jnp.dot(x, in_w_ref[...],
                             preferred_element_type=jnp.float32)
                     + in_b_ref[...])

    h = h_sc[...]                                               # (S, d_model)

    # ---- MICPearsonAttention: fused QKV projection (single wide matmul) ----
    qkv = jnp.dot(h, wqkv_ref[...], preferred_element_type=jnp.float32)
    q_off, k_off, v_off = 0, n_heads * d_k, 2 * n_heads * d_k

    # Per-head attention; the head-concat + fc projection is folded into a sum
    # of per-head (S, d_v) @ (d_v, d_model) contributions.
    fc_out = None
    for hd in range(n_heads):
        q = qkv[:, q_off + hd * d_k: q_off + (hd + 1) * d_k]    # (S, d_k)
        k = qkv[:, k_off + hd * d_k: k_off + (hd + 1) * d_k]    # (S, d_k)
        v = qkv[:, v_off + hd * d_v: v_off + (hd + 1) * d_v]    # (S, d_v)

        # scores: contract last dims (no explicit transpose of K).
        s = jax.lax.dot_general(q, k, (((1,), (1,)), ((), ())),
                                preferred_element_type=jnp.float32) * scale
        m = jnp.max(s, axis=-1, keepdims=True)
        e = jnp.exp(s - m)
        p = e * pl.reciprocal(jnp.sum(e, axis=-1, keepdims=True), approx=True)

        o_h = jnp.dot(p, v, preferred_element_type=jnp.float32)          # (S, d_v)
        wo_h = wo_ref[hd * d_v:(hd + 1) * d_v, :]                         # (d_v, D)
        contrib = jnp.dot(o_h, wo_h, preferred_element_type=jnp.float32)  # (S, D)
        fc_out = contrib if fc_out is None else fc_out + contrib

    # ---- fused back-to-back LayerNorms: attn LN (1e-6) then residual LN1 ----
    attn_out = _layernorm(h + fc_out, ga_ref[...], ba_ref[...], 1e-6)
    h1 = _layernorm(h + attn_out, g1_ref[...], b1_ref[...], 1e-5)

    # ---- FFN (Linear + ReLU + Linear, with bias) + residual LN2 ----
    f = jnp.maximum(jnp.dot(h1, w1_ref[...],
                            preferred_element_type=jnp.float32) + fb1_ref[...],
                    0.0)
    ffn_out = (jnp.dot(f, w2_ref[...],
                       preferred_element_type=jnp.float32) + fb2_ref[...])
    h2 = _layernorm(h1 + ffn_out, g2_ref[...], b2_ref[...], 1e-5)

    # TODO(synk): dropout omitted (eval-mode / inference semantics -> identity)

    h_sc[...] = h2                                              # carry to next layer

    # ---- final encoder LayerNorm, written once at the last layer step ----
    @pl.when(l == n_layers - 1)
    def _():
        o_ref[0] = _layernorm(h2, gf_ref[...], bf_ref[...], 1e-5)


# ------------------------------ Model (glue) -------------------------------- #

def init_params(key, cfg):
    d_model, H = cfg['d_model'], cfg['n_heads']
    dk, dv, d_ff = cfg['d_k'], cfg['d_v'], cfg['d_ff']
    in_dim, L = cfg['input_dim'], cfg['n_layers']
    qkv_n = H * (2 * dk + dv)

    def dense(k, shape, fan_in):
        return jax.random.normal(k, shape, jnp.float32) * (fan_in ** -0.5)

    ks = jax.random.split(key, 8)
    return {
        'in_w': dense(ks[0], (in_dim, d_model), in_dim),
        'in_b': jax.random.normal(ks[1], (d_model,), jnp.float32) * 0.01,
        # Per-layer weights stacked along a leading layer axis.
        # wqkv = concat(Wq | Wk | Wv) along the output dim (fused projection).
        'wqkv': dense(ks[2], (L, d_model, qkv_n), d_model),
        'wo':   dense(ks[3], (L, H * dv, d_model), H * dv),
        'w1':   dense(ks[4], (L, d_model, d_ff), d_model),
        'b1':   jax.random.normal(ks[5], (L, 1, d_ff), jnp.float32) * 0.01,
        'w2':   dense(ks[6], (L, d_ff, d_model), d_ff),
        'b2':   jax.random.normal(ks[7], (L, 1, d_model), jnp.float32) * 0.01,
        'ln_attn_g': jnp.ones((L, 1, d_model), jnp.float32),
        'ln_attn_b': jnp.zeros((L, 1, d_model), jnp.float32),
        'ln1_g': jnp.ones((L, 1, d_model), jnp.float32),
        'ln1_b': jnp.zeros((L, 1, d_model), jnp.float32),
        'ln2_g': jnp.ones((L, 1, d_model), jnp.float32),
        'ln2_b': jnp.zeros((L, 1, d_model), jnp.float32),
        'norm_g': jnp.ones((d_model,), jnp.float32),
        'norm_b': jnp.zeros((d_model,), jnp.float32),
    }


def encoder_forward(params, x, cfg):
    B, S, in_dim = x.shape
    d_model, H = cfg['d_model'], cfg['n_heads']
    dk, dv, d_ff, L = cfg['d_k'], cfg['d_v'], cfg['d_ff'], cfg['n_layers']
    assert H * dv == d_model  # required by the .view(B, S, d_model) in PyTorch
    qkv_n = H * (2 * dk + dv)

    kernel = functools.partial(_encoder_kernel, n_heads=H, d_k=dk, d_v=dv,
                               scale=1.0 / (float(dk) ** 0.5))

    def bmap(b, l):   # batch-indexed activations (constant across layer axis)
        return (b, 0, 0)

    def wmap2(b, l):  # shared 2-D params (input proj, final LN)
        return (0, 0)

    def lmap3(b, l):  # layer-stacked params
        return (l, 0, 0)

    out = pl.pallas_call(
        kernel,
        grid=(B, L),
        in_specs=[
            pl.BlockSpec((1, S, in_dim), bmap),              # x
            pl.BlockSpec((in_dim, d_model), wmap2),          # in_w
            pl.BlockSpec((1, d_model), wmap2),               # in_b
            pl.BlockSpec((None, d_model, qkv_n), lmap3),     # wqkv
            pl.BlockSpec((None, H * dv, d_model), lmap3),    # wo
            pl.BlockSpec((None, 1, d_model), lmap3),         # ln_attn gamma
            pl.BlockSpec((None, 1, d_model), lmap3),         # ln_attn beta
            pl.BlockSpec((None, 1, d_model), lmap3),         # ln1 gamma
            pl.BlockSpec((None, 1, d_model), lmap3),         # ln1 beta
            pl.BlockSpec((None, d_model, d_ff), lmap3),      # w1
            pl.BlockSpec((None, 1, d_ff), lmap3),            # b1
            pl.BlockSpec((None, d_ff, d_model), lmap3),      # w2
            pl.BlockSpec((None, 1, d_model), lmap3),         # b2
            pl.BlockSpec((None, 1, d_model), lmap3),         # ln2 gamma
            pl.BlockSpec((None, 1, d_model), lmap3),         # ln2 beta
            pl.BlockSpec((1, d_model), wmap2),               # final norm gamma
            pl.BlockSpec((1, d_model), wmap2),               # final norm beta
        ],
        out_specs=pl.BlockSpec((1, S, d_model), bmap),
        out_shape=jax.ShapeDtypeStruct((B, S, d_model), jnp.float32),
        scratch_shapes=[pltpu.VMEM((S, d_model), jnp.float32)],
        compiler_params=pltpu.CompilerParams(
            dimension_semantics=("parallel", "arbitrary")),
    )(x,
      params['in_w'], params['in_b'].reshape(1, d_model),
      params['wqkv'], params['wo'],
      params['ln_attn_g'], params['ln_attn_b'],
      params['ln1_g'], params['ln1_b'],
      params['w1'], params['b1'], params['w2'], params['b2'],
      params['ln2_g'], params['ln2_b'],
      params['norm_g'].reshape(1, d_model),
      params['norm_b'].reshape(1, d_model))
    return out


if __name__ == "__main__":
    cfg = dict(input_dim=16, seq_length=8, d_model=32, n_heads=4,
               n_layers=2, d_ff=64, d_k=8, d_v=8)
    key = jax.random.PRNGKey(0)
    pkey, xkey = jax.random.split(key)
    params = init_params(pkey, cfg)
    x = jax.random.normal(xkey, (2, cfg['seq_length'], cfg['input_dim']),
                          dtype=jnp.float32)

    fwd = jax.jit(functools.partial(encoder_forward, cfg=cfg))
    out = fwd(params, x)
    jax.block_until_ready(out)

    assert out.shape == (2, cfg['seq_length'], cfg['d_model'])
    assert bool(jnp.all(jnp.isfinite(out)))
    print("KERNEL_OK")
</pallas_src>

<mosaic_0001>
module attributes {stable_mosaic.version = 11 : i64} {
  func.func @_encoder_kernel(%arg0: i32, %arg1: i32, %arg2: memref<1x8x16xf32, #tpu.memory_space<vmem>>, %arg3: memref<16x32xf32, #tpu.memory_space<vmem>>, %arg4: memref<1x32xf32, #tpu.memory_space<vmem>>, %arg5: memref<1x32x96xf32, #tpu.memory_space<vmem>>, %arg6: memref<1x32x32xf32, #tpu.memory_space<vmem>>, %arg7: memref<1x1x32xf32, #tpu.memory_space<vmem>>, %arg8: memref<1x1x32xf32, #tpu.memory_space<vmem>>, %arg9: memref<1x1x32xf32, #tpu.memory_space<vmem>>, %arg10: memref<1x1x32xf32, #tpu.memory_space<vmem>>, %arg11: memref<1x32x64xf32, #tpu.memory_space<vmem>>, %arg12: memref<1x1x64xf32, #tpu.memory_space<vmem>>, %arg13: memref<1x64x32xf32, #tpu.memory_space<vmem>>, %arg14: memref<1x1x32xf32, #tpu.memory_space<vmem>>, %arg15: memref<1x1x32xf32, #tpu.memory_space<vmem>>, %arg16: memref<1x1x32xf32, #tpu.memory_space<vmem>>, %arg17: memref<1x32xf32, #tpu.memory_space<vmem>>, %arg18: memref<1x32xf32, #tpu.memory_space<vmem>>, %arg19: memref<1x8x32xf32, #tpu.memory_space<vmem>>, %arg20: memref<8x32xf32, #tpu.memory_space<vmem>>) attributes {dimension_semantics = [#tpu.dimension_semantics<parallel>, #tpu.dimension_semantics<arbitrary>], iteration_bounds = array<i64: 2, 2>, scalar_prefetch = 0 : i64, scratch_operands = 1 : i64, tpu.core_type = #tpu.core_type<tc>, window_params = [{transform_indices = @transform_0, window_bounds = array<i64: 1, 8, 16>}, {pipeline_mode = #tpu.pipeline_mode<synchronous>, transform_indices = @transform_1, window_bounds = array<i64: 16, 32>}, {pipeline_mode = #tpu.pipeline_mode<synchronous>, transform_indices = @transform_2, window_bounds = array<i64: 1, 32>}, {transform_indices = @transform_3, window_bounds = array<i64: 1, 32, 96>}, {transform_indices = @transform_4, window_bounds = array<i64: 1, 32, 32>}, {transform_indices = @transform_5, window_bounds = array<i64: 1, 1, 32>}, {transform_indices = @transform_6, window_bounds = array<i64: 1, 1, 32>}, {transform_indices = @transform_7, window_bounds = array<i64: 1, 1, 32>}, {transform_indices = @transform_8, window_bounds = array<i64: 1, 1, 32>}, {transform_indices = @transform_9, window_bounds = array<i64: 1, 32, 64>}, {transform_indices = @transform_10, window_bounds = array<i64: 1, 1, 64>}, {transform_indices = @transform_11, window_bounds = array<i64: 1, 64, 32>}, {transform_indices = @transform_12, window_bounds = array<i64: 1, 1, 32>}, {transform_indices = @transform_13, window_bounds = array<i64: 1, 1, 32>}, {transform_indices = @transform_14, window_bounds = array<i64: 1, 1, 32>}, {pipeline_mode = #tpu.pipeline_mode<synchronous>, transform_indices = @transform_15, window_bounds = array<i64: 1, 32>}, {pipeline_mode = #tpu.pipeline_mode<synchronous>, transform_indices = @transform_16, window_bounds = array<i64: 1, 32>}, {transform_indices = @transform_17, window_bounds = array<i64: 1, 8, 32>}]} {
    %c0_i32 = arith.constant 0 : i32
    %0 = arith.cmpi eq, %arg1, %c0_i32 : i32
    %1 = arith.extui %0 : i1 to i32
    %c0_i32_0 = arith.constant 0 : i32
    %2 = arith.cmpi ne, %1, %c0_i32_0 : i32
    scf.if %2 {
      %c0_89 = arith.constant 0 : index
      %c0_90 = arith.constant 0 : index
      %c0_91 = arith.constant 0 : index
      %191 = vector.load %arg2[%c0_89, %c0_90, %c0_91] : memref<1x8x16xf32, #tpu.memory_space<vmem>>, vector<1x8x16xf32>
      %192 = vector.shape_cast %191 : vector<1x8x16xf32> to vector<8x16xf32>
      %c0_92 = arith.constant 0 : index
      %c0_93 = arith.constant 0 : index
      %193 = vector.load %arg3[%c0_92, %c0_93] : memref<16x32xf32, #tpu.memory_space<vmem>>, vector<16x32xf32>
      %cst_94 = arith.constant dense<0.000000e+00> : vector<8x32xf32>
      %194 = tpu.matmul %192, %193, %cst_94 {dimension_numbers = #tpu.dot_dimension_numbers<[1], [0], [0], [1], [0, 0, 1, 1], [], []>} : vector<8x16xf32>, vector<16x32xf32>, vector<8x32xf32> -> vector<8x32xf32>
      %c0_95 = arith.constant 0 : index
      %c0_96 = arith.constant 0 : index
      %195 = vector.load %arg4[%c0_95, %c0_96] : memref<1x32xf32, #tpu.memory_space<vmem>>, vector<1x32xf32>
      %196 = vector.broadcast %195 : vector<1x32xf32> to vector<8x32xf32>
      %197 = arith.addf %194, %196 : vector<8x32xf32>
      %c0_97 = arith.constant 0 : index
      %c0_98 = arith.constant 0 : index
      %198 = vector.load %arg20[%c0_97, %c0_98] : memref<8x32xf32, #tpu.memory_space<vmem>>, vector<8x32xf32>
      tpu.vector_store %arg20[%c0_97, %c0_98], %197 {strides = array<i32>} : memref<8x32xf32, #tpu.memory_space<vmem>>, vector<8x32xf32>,
    } else {
    }
    %c0 = arith.constant 0 : index
    %c0_1 = arith.constant 0 : index
    %3 = vector.load %arg20[%c0, %c0_1] : memref<8x32xf32, #tpu.memory_space<vmem>>, vector<8x32xf32>
    %c0_2 = arith.constant 0 : index
    %c0_3 = arith.constant 0 : index
    %c0_4 = arith.constant 0 : index
    %4 = vector.load %arg5[%c0_2, %c0_3, %c0_4] : memref<1x32x96xf32, #tpu.memory_space<vmem>>, vector<1x32x96xf32>
    %5 = vector.shape_cast %4 : vector<1x32x96xf32> to vector<32x96xf32>
    %cst = arith.constant dense<0.000000e+00> : vector<8x96xf32>
    %6 = tpu.matmul %3, %5, %cst {dimension_numbers = #tpu.dot_dimension_numbers<[1], [0], [0], [1], [0, 0, 1, 1], [], []>} : vector<8x32xf32>, vector<32x96xf32>, vector<8x96xf32> -> vector<8x96xf32>
    %7 = vector.extract_strided_slice %6 {offsets = [0, 0], sizes = [8, 8], strides = [1, 1]} : vector<8x96xf32> to vector<8x8xf32>
    %8 = vector.extract_strided_slice %6 {offsets = [0, 32], sizes = [8, 8], strides = [1, 1]} : vector<8x96xf32> to vector<8x8xf32>
    %9 = vector.extract_strided_slice %6 {offsets = [0, 64], sizes = [8, 8], strides = [1, 1]} : vector<8x96xf32> to vector<8x8xf32>
    %cst_5 = arith.constant dense<0.000000e+00> : vector<8x8xf32>
    %10 = tpu.matmul %7, %8, %cst_5 {dimension_numbers = #tpu.dot_dimension_numbers<[1], [1], [0], [0], [0, 0, 1, 0], [], []>} : vector<8x8xf32>, vector<8x8xf32>, vector<8x8xf32> -> vector<8x8xf32>
    %cst_6 = arith.constant 0.353553385 : f32
    %11 = vector.broadcast %cst_6 : f32 to vector<8x8xf32>
    %12 = arith.mulf %10, %11 : vector<8x8xf32>
    %cst_7 = arith.constant dense<0xFF800000> : vector<8xf32>
    %13 = vector.multi_reduction <maximumf>, %12, %cst_7 [1] : vector<8x8xf32> to vector<8xf32>
    %14 = vector.shape_cast %13 : vector<8xf32> to vector<8x1xf32>
    %15 = vector.broadcast %14 : vector<8x1xf32> to vector<8x8xf32>
    %16 = arith.subf %12, %15 : vector<8x8xf32>
    %17 = math.exp %16 : vector<8x8xf32>
    %cst_8 = arith.constant dense<0.000000e+00> : vector<8xf32>
    %18 = vector.multi_reduction <add>, %17, %cst_8 [1] : vector<8x8xf32> to vector<8xf32>
    %19 = vector.shape_cast %18 : vector<8xf32> to vector<8x1xf32>
    %20 = tpu.reciprocal %19 {approx = true} : vector<8x1xf32> -> vector<8x1xf32>
    %21 = vector.broadcast %20 : vector<8x1xf32> to vector<8x8xf32>
    %22 = arith.mulf %17, %21 : vector<8x8xf32>
    %cst_9 = arith.constant dense<0.000000e+00> : vector<8x8xf32>
    %23 = tpu.matmul %22, %9, %cst_9 {dimension_numbers = #tpu.dot_dimension_numbers<[1], [0], [0], [1], [0, 0, 1, 1], [], []>} : vector<8x8xf32>, vector<8x8xf32>, vector<8x8xf32> -> vector<8x8xf32>
    %c0_10 = arith.constant 0 : index
    %c0_11 = arith.constant 0 : index
    %c0_12 = arith.constant 0 : index
    %24 = vector.load %arg6[%c0_10, %c0_11, %c0_12] : memref<1x32x32xf32, #tpu.memory_space<vmem>>, vector<1x8x32xf32>
    %25 = vector.shape_cast %24 : vector<1x8x32xf32> to vector<8x32xf32>
    %cst_13 = arith.constant dense<0.000000e+00> : vector<8x32xf32>
    %26 = tpu.matmul %23, %25, %cst_13 {dimension_numbers = #tpu.dot_dimension_numbers<[1], [0], [0], [1], [0, 0, 1, 1], [], []>} : vector<8x8xf32>, vector<8x32xf32>, vector<8x32xf32> -> vector<8x32xf32>
    %27 = vector.extract_strided_slice %6 {offsets = [0, 8], sizes = [8, 8], strides = [1, 1]} : vector<8x96xf32> to vector<8x8xf32>
    %28 = vector.extract_strided_slice %6 {offsets = [0, 40], sizes = [8, 8], strides = [1, 1]} : vector<8x96xf32> to vector<8x8xf32>
    %29 = vector.extract_strided_slice %6 {offsets = [0, 72], sizes = [8, 8], strides = [1, 1]} : vector<8x96xf32> to vector<8x8xf32>
    %cst_14 = arith.constant dense<0.000000e+00> : vector<8x8xf32>
    %30 = tpu.matmul %27, %28, %cst_14 {dimension_numbers = #tpu.dot_dimension_numbers<[1], [1], [0], [0], [0, 0, 1, 0], [], []>} : vector<8x8xf32>, vector<8x8xf32>, vector<8x8xf32> -> vector<8x8xf32>
    %cst_15 = arith.constant 0.353553385 : f32
    %31 = vector.broadcast %cst_15 : f32 to vector<8x8xf32>
    %32 = arith.mulf %30, %31 : vector<8x8xf32>
    %cst_16 = arith.constant dense<0xFF800000> : vector<8xf32>
    %33 = vector.multi_reduction <maximumf>, %32, %cst_16 [1] : vector<8x8xf32> to vector<8xf32>
    %34 = vector.shape_cast %33 : vector<8xf32> to vector<8x1xf32>
    %35 = vector.broadcast %34 : vector<8x1xf32> to vector<8x8xf32>
    %36 = arith.subf %32, %35 : vector<8x8xf32>
    %37 = math.exp %36 : vector<8x8xf32>
    %cst_17 = arith.constant dense<0.000000e+00> : vector<8xf32>
    %38 = vector.multi_reduction <add>, %37, %cst_17 [1] : vector<8x8xf32> to vector<8xf32>
    %39 = vector.shape_cast %38 : vector<8xf32> to vector<8x1xf32>
    %40 = tpu.reciprocal %39 {approx = true} : vector<8x1xf32> -> vector<8x1xf32>
    %41 = vector.broadcast %40 : vector<8x1xf32> to vector<8x8xf32>
    %42 = arith.mulf %37, %41 : vector<8x8xf32>
    %cst_18 = arith.constant dense<0.000000e+00> : vector<8x8xf32>
    %43 = tpu.matmul %42, %29, %cst_18 {dimension_numbers = #tpu.dot_dimension_numbers<[1], [0], [0], [1], [0, 0, 1, 1], [], []>} : vector<8x8xf32>, vector<8x8xf32>, vector<8x8xf32> -> vector<8x8xf32>
    %c0_19 = arith.constant 0 : index
    %c8 = arith.constant 8 : index
    %c0_20 = arith.constant 0 : index
    %44 = vector.load %arg6[%c0_19, %c8, %c0_20] : memref<1x32x32xf32, #tpu.memory_space<vmem>>, vector<1x8x32xf32>
    %45 = vector.shape_cast %44 : vector<1x8x32xf32> to vector<8x32xf32>
    %cst_21 = arith.constant dense<0.000000e+00> : vector<8x32xf32>
    %46 = tpu.matmul %43, %45, %cst_21 {dimension_numbers = #tpu.dot_dimension_numbers<[1], [0], [0], [1], [0, 0, 1, 1], [], []>} : vector<8x8xf32>, vector<8x32xf32>, vector<8x32xf32> -> vector<8x32xf32>
    %47 = arith.addf %26, %46 : vector<8x32xf32>
    %48 = vector.extract_strided_slice %6 {offsets = [0, 16], sizes = [8, 8], strides = [1, 1]} : vector<8x96xf32> to vector<8x8xf32>
    %49 = vector.extract_strided_slice %6 {offsets = [0, 48], sizes = [8, 8], strides = [1, 1]} : vector<8x96xf32> to vector<8x8xf32>
    %50 = vector.extract_strided_slice %6 {offsets = [0, 80], sizes = [8, 8], strides = [1, 1]} : vector<8x96xf32> to vector<8x8xf32>
    %cst_22 = arith.constant dense<0.000000e+00> : vector<8x8xf32>
    %51 = tpu.matmul %48, %49, %cst_22 {dimension_numbers = #tpu.dot_dimension_numbers<[1], [1], [0], [0], [0, 0, 1, 0], [], []>} : vector<8x8xf32>, vector<8x8xf32>, vector<8x8xf32> -> vector<8x8xf32>
    %cst_23 = arith.constant 0.353553385 : f32
    %52 = vector.broadcast %cst_23 : f32 to vector<8x8xf32>
    %53 = arith.mulf %51, %52 : vector<8x8xf32>
    %cst_24 = arith.constant dense<0xFF800000> : vector<8xf32>
    %54 = vector.multi_reduction <maximumf>, %53, %cst_24 [1] : vector<8x8xf32> to vector<8xf32>
    %55 = vector.shape_cast %54 : vector<8xf32> to vector<8x1xf32>
    %56 = vector.broadcast %55 : vector<8x1xf32> to vector<8x8xf32>
    %57 = arith.subf %53, %56 : vector<8x8xf32>
    %58 = math.exp %57 : vector<8x8xf32>
    %cst_25 = arith.constant dense<0.000000e+00> : vector<8xf32>
    %59 = vector.multi_reduction <add>, %58, %cst_25 [1] : vector<8x8xf32> to vector<8xf32>
    %60 = vector.shape_cast %59 : vector<8xf32> to vector<8x1xf32>
    %61 = tpu.reciprocal %60 {approx = true} : vector<8x1xf32> -> vector<8x1xf32>
    %62 = vector.broadcast %61 : vector<8x1xf32> to vector<8x8xf32>
    %63 = arith.mulf %58, %62 : vector<8x8xf32>
    %cst_26 = arith.constant dense<0.000000e+00> : vector<8x8xf32>
    %64 = tpu.matmul %63, %50, %cst_26 {dimension_numbers = #tpu.dot_dimension_numbers<[1], [0], [0], [1], [0, 0, 1, 1], [], []>} : vector<8x8xf32>, vector<8x8xf32>, vector<8x8xf32> -> vector<8x8xf32>
    %c0_27 = arith.constant 0 : index
    %c16 = arith.constant 16 : index
    %c0_28 = arith.constant 0 : index
    %65 = vector.load %arg6[%c0_27, %c16, %c0_28] : memref<1x32x32xf32, #tpu.memory_space<vmem>>, vector<1x8x32xf32>
    %66 = vector.shape_cast %65 : vector<1x8x32xf32> to vector<8x32xf32>
    %cst_29 = arith.constant dense<0.000000e+00> : vector<8x32xf32>
    %67 = tpu.matmul %64, %66, %cst_29 {dimension_numbers = #tpu.dot_dimension_numbers<[1], [0], [0], [1], [0, 0, 1, 1], [], []>} : vector<8x8xf32>, vector<8x32xf32>, vector<8x32xf32> -> vector<8x32xf32>
    %68 = arith.addf %47, %67 : vector<8x32xf32>
    %69 = vector.extract_strided_slice %6 {offsets = [0, 24], sizes = [8, 8], strides = [1, 1]} : vector<8x96xf32> to vector<8x8xf32>
    %70 = vector.extract_strided_slice %6 {offsets = [0, 56], sizes = [8, 8], strides = [1, 1]} : vector<8x96xf32> to vector<8x8xf32>
    %71 = vector.extract_strided_slice %6 {offsets = [0, 88], sizes = [8, 8], strides = [1, 1]} : vector<8x96xf32> to vector<8x8xf32>
    %cst_30 = arith.constant dense<0.000000e+00> : vector<8x8xf32>
    %72 = tpu.matmul %69, %70, %cst_30 {dimension_numbers = #tpu.dot_dimension_numbers<[1], [1], [0], [0], [0, 0, 1, 0], [], []>} : vector<8x8xf32>, vector<8x8xf32>, vector<8x8xf32> -> vector<8x8xf32>
    %cst_31 = arith.constant 0.353553385 : f32
    %73 = vector.broadcast %cst_31 : f32 to vector<8x8xf32>
    %74 = arith.mulf %72, %73 : vector<8x8xf32>
    %cst_32 = arith.constant dense<0xFF800000> : vector<8xf32>
    %75 = vector.multi_reduction <maximumf>, %74, %cst_32 [1] : vector<8x8xf32> to vector<8xf32>
    %76 = vector.shape_cast %75 : vector<8xf32> to vector<8x1xf32>
    %77 = vector.broadcast %76 : vector<8x1xf32> to vector<8x8xf32>
    %78 = arith.subf %74, %77 : vector<8x8xf32>
    %79 = math.exp %78 : vector<8x8xf32>
    %cst_33 = arith.constant dense<0.000000e+00> : vector<8xf32>
    %80 = vector.multi_reduction <add>, %79, %cst_33 [1] : vector<8x8xf32> to vector<8xf32>
    %81 = vector.shape_cast %80 : vector<8xf32> to vector<8x1xf32>
    %82 = tpu.reciprocal %81 {approx = true} : vector<8x1xf32> -> vector<8x1xf32>
    %83 = vector.broadcast %82 : vector<8x1xf32> to vector<8x8xf32>
    %84 = arith.mulf %79, %83 : vector<8x8xf32>
    %cst_34 = arith.constant dense<0.000000e+00> : vector<8x8xf32>
    %85 = tpu.matmul %84, %71, %cst_34 {dimension_numbers = #tpu.dot_dimension_numbers<[1], [0], [0], [1], [0, 0, 1, 1], [], []>} : vector<8x8xf32>, vector<8x8xf32>, vector<8x8xf32> -> vector<8x8xf32>
    %c0_35 = arith.constant 0 : index
    %c24 = arith.constant 24 : index
    %c0_36 = arith.constant 0 : index
    %86 = vector.load %arg6[%c0_35, %c24, %c0_36] : memref<1x32x32xf32, #tpu.memory_space<vmem>>, vector<1x8x32xf32>
    %87 = vector.shape_cast %86 : vector<1x8x32xf32> to vector<8x32xf32>
    %cst_37 = arith.constant dense<0.000000e+00> : vector<8x32xf32>
    %88 = tpu.matmul %85, %87, %cst_37 {dimension_numbers = #tpu.dot_dimension_numbers<[1], [0], [0], [1], [0, 0, 1, 1], [], []>} : vector<8x8xf32>, vector<8x32xf32>, vector<8x32xf32> -> vector<8x32xf32>
    %89 = arith.addf %68, %88 : vector<8x32xf32>
    %90 = arith.addf %3, %89 : vector<8x32xf32>
    %c0_38 = arith.constant 0 : index
    %c0_39 = arith.constant 0 : index
    %c0_40 = arith.constant 0 : index
    %91 = vector.load %arg7[%c0_38, %c0_39, %c0_40] : memref<1x1x32xf32, #tpu.memory_space<vmem>>, vector<1x1x32xf32>
    %92 = vector.shape_cast %91 : vector<1x1x32xf32> to vector<1x32xf32>
    %c0_41 = arith.constant 0 : index
    %c0_42 = arith.constant 0 : index
    %c0_43 = arith.constant 0 : index
    %93 = vector.load %arg8[%c0_41, %c0_42, %c0_43] : memref<1x1x32xf32, #tpu.memory_space<vmem>>, vector<1x1x32xf32>
    %94 = vector.shape_cast %93 : vector<1x1x32xf32> to vector<1x32xf32>
    %cst_44 = arith.constant dense<0.000000e+00> : vector<8xf32>
    %95 = vector.multi_reduction <add>, %90, %cst_44 [1] : vector<8x32xf32> to vector<8xf32>
    %96 = vector.shape_cast %95 : vector<8xf32> to vector<8x1xf32>
    %cst_45 = arith.constant 3.200000e+01 : f32
    %97 = vector.broadcast %cst_45 : f32 to vector<8x1xf32>
    %98 = arith.divf %96, %97 : vector<8x1xf32>
    %99 = vector.broadcast %98 : vector<8x1xf32> to vector<8x32xf32>
    %100 = arith.subf %90, %99 : vector<8x32xf32>
    %101 = arith.mulf %100, %100 : vector<8x32xf32>
    %cst_46 = arith.constant dense<0.000000e+00> : vector<8xf32>
    %102 = vector.multi_reduction <add>, %101, %cst_46 [1] : vector<8x32xf32> to vector<8xf32>
    %103 = vector.shape_cast %102 : vector<8xf32> to vector<8x1xf32>
    %cst_47 = arith.constant 3.200000e+01 : f32
    %104 = vector.broadcast %cst_47 : f32 to vector<8x1xf32>
    %105 = arith.divf %103, %104 : vector<8x1xf32>
    %106 = vector.broadcast %98 : vector<8x1xf32> to vector<8x32xf32>
    %107 = arith.subf %90, %106 : vector<8x32xf32>
    %cst_48 = arith.constant 9.99999997E-7 : f32
    %108 = vector.broadcast %cst_48 : f32 to vector<8x1xf32>
    %109 = arith.addf %105, %108 : vector<8x1xf32>
    %110 = math.rsqrt %109 : vector<8x1xf32>
    %111 = vector.broadcast %110 : vector<8x1xf32> to vector<8x32xf32>
    %112 = arith.mulf %107, %111 : vector<8x32xf32>
    %113 = vector.broadcast %92 : vector<1x32xf32> to vector<8x32xf32>
    %114 = arith.mulf %112, %113 : vector<8x32xf32>
    %115 = vector.broadcast %94 : vector<1x32xf32> to vector<8x32xf32>
    %116 = arith.addf %114, %115 : vector<8x32xf32>
    %117 = arith.addf %3, %116 : vector<8x32xf32>
    %c0_49 = arith.constant 0 : index
    %c0_50 = arith.constant 0 : index
    %c0_51 = arith.constant 0 : index
    %118 = vector.load %arg9[%c0_49, %c0_50, %c0_51] : memref<1x1x32xf32, #tpu.memory_space<vmem>>, vector<1x1x32xf32>
    %119 = vector.shape_cast %118 : vector<1x1x32xf32> to vector<1x32xf32>
    %c0_52 = arith.constant 0 : index
    %c0_53 = arith.constant 0 : index
    %c0_54 = arith.constant 0 : index
    %120 = vector.load %arg10[%c0_52, %c0_53, %c0_54] : memref<1x1x32xf32, #tpu.memory_space<vmem>>, vector<1x1x32xf32>
    %121 = vector.shape_cast %120 : vector<1x1x32xf32> to vector<1x32xf32>
    %cst_55 = arith.constant dense<0.000000e+00> : vector<8xf32>
    %122 = vector.multi_reduction <add>, %117, %cst_55 [1] : vector<8x32xf32> to vector<8xf32>
    %123 = vector.shape_cast %122 : vector<8xf32> to vector<8x1xf32>
    %cst_56 = arith.constant 3.200000e+01 : f32
    %124 = vector.broadcast %cst_56 : f32 to vector<8x1xf32>
    %125 = arith.divf %123, %124 : vector<8x1xf32>
    %126 = vector.broadcast %125 : vector<8x1xf32> to vector<8x32xf32>
    %127 = arith.subf %117, %126 : vector<8x32xf32>
    %128 = arith.mulf %127, %127 : vector<8x32xf32>
    %cst_57 = arith.constant dense<0.000000e+00> : vector<8xf32>
    %129 = vector.multi_reduction <add>, %128, %cst_57 [1] : vector<8x32xf32> to vector<8xf32>
    %130 = vector.shape_cast %129 : vector<8xf32> to vector<8x1xf32>
    %cst_58 = arith.constant 3.200000e+01 : f32
    %131 = vector.broadcast %cst_58 : f32 to vector<8x1xf32>
    %132 = arith.divf %130, %131 : vector<8x1xf32>
    %133 = vector.broadcast %125 : vector<8x1xf32> to vector<8x32xf32>
    %134 = arith.subf %117, %133 : vector<8x32xf32>
    %cst_59 = arith.constant 9.99999974E-6 : f32
    %135 = vector.broadcast %cst_59 : f32 to vector<8x1xf32>
    %136 = arith.addf %132, %135 : vector<8x1xf32>
    %137 = math.rsqrt %136 : vector<8x1xf32>
    %138 = vector.broadcast %137 : vector<8x1xf32> to vector<8x32xf32>
    %139 = arith.mulf %134, %138 : vector<8x32xf32>
    %140 = vector.broadcast %119 : vector<1x32xf32> to vector<8x32xf32>
    %141 = arith.mulf %139, %140 : vector<8x32xf32>
    %142 = vector.broadcast %121 : vector<1x32xf32> to vector<8x32xf32>
    %143 = arith.addf %141, %142 : vector<8x32xf32>
    %c0_60 = arith.constant 0 : index
    %c0_61 = arith.constant 0 : index
    %c0_62 = arith.constant 0 : index
    %144 = vector.load %arg11[%c0_60, %c0_61, %c0_62] : memref<1x32x64xf32, #tpu.memory_space<vmem>>, vector<1x32x64xf32>
    %145 = vector.shape_cast %144 : vector<1x32x64xf32> to vector<32x64xf32>
    %cst_63 = arith.constant dense<0.000000e+00> : vector<8x64xf32>
    %146 = tpu.matmul %143, %145, %cst_63 {dimension_numbers = #tpu.dot_dimension_numbers<[1], [0], [0], [1], [0, 0, 1, 1], [], []>} : vector<8x32xf32>, vector<32x64xf32>, vector<8x64xf32> -> vector<8x64xf32>
    %c0_64 = arith.constant 0 : index
    %c0_65 = arith.constant 0 : index
    %c0_66 = arith.constant 0 : index
    %147 = vector.load %arg12[%c0_64, %c0_65, %c0_66] : memref<1x1x64xf32, #tpu.memory_space<vmem>>, vector<1x1x64xf32>
    %148 = vector.shape_cast %147 : vector<1x1x64xf32> to vector<1x64xf32>
    %149 = vector.broadcast %148 : vector<1x64xf32> to vector<8x64xf32>
    %150 = arith.addf %146, %149 : vector<8x64xf32>
    %cst_67 = arith.constant 0.000000e+00 : f32
    %151 = vector.broadcast %cst_67 : f32 to vector<8x64xf32>
    %152 = arith.maximumf %150, %151 : vector<8x64xf32>
    %c0_68 = arith.constant 0 : index
    %c0_69 = arith.constant 0 : index
    %c0_70 = arith.constant 0 : index
    %153 = vector.load %arg13[%c0_68, %c0_69, %c0_70] : memref<1x64x32xf32, #tpu.memory_space<vmem>>, vector<1x64x32xf32>
    %154 = vector.shape_cast %153 : vector<1x64x32xf32> to vector<64x32xf32>
    %cst_71 = arith.constant dense<0.000000e+00> : vector<8x32xf32>
    %155 = tpu.matmul %152, %154, %cst_71 {dimension_numbers = #tpu.dot_dimension_numbers<[1], [0], [0], [1], [0, 0, 1, 1], [], []>} : vector<8x64xf32>, vector<64x32xf32>, vector<8x32xf32> -> vector<8x32xf32>
    %c0_72 = arith.constant 0 : index
    %c0_73 = arith.constant 0 : index
    %c0_74 = arith.constant 0 : index
    %156 = vector.load %arg14[%c0_72, %c0_73, %c0_74] : memref<1x1x32xf32, #tpu.memory_space<vmem>>, vector<1x1x32xf32>
    %157 = vector.shape_cast %156 : vector<1x1x32xf32> to vector<1x32xf32>
    %158 = vector.broadcast %157 : vector<1x32xf32> to vector<8x32xf32>
    %159 = arith.addf %155, %158 : vector<8x32xf32>
    %160 = arith.addf %143, %159 : vector<8x32xf32>
    %c0_75 = arith.constant 0 : index
    %c0_76 = arith.constant 0 : index
    %c0_77 = arith.constant 0 : index
    %161 = vector.load %arg15[%c0_75, %c0_76, %c0_77] : memref<1x1x32xf32, #tpu.memory_space<vmem>>, vector<1x1x32xf32>
    %162 = vector.shape_cast %161 : vector<1x1x32xf32> to vector<1x32xf32>
    %c0_78 = arith.constant 0 : index
    %c0_79 = arith.constant 0 : index
    %c0_80 = arith.constant 0 : index
    %163 = vector.load %arg16[%c0_78, %c0_79, %c0_80] : memref<1x1x32xf32, #tpu.memory_space<vmem>>, vector<1x1x32xf32>
    %164 = vector.shape_cast %163 : vector<1x1x32xf32> to vector<1x32xf32>
    %cst_81 = arith.constant dense<0.000000e+00> : vector<8xf32>
    %165 = vector.multi_reduction <add>, %160, %cst_81 [1] : vector<8x32xf32> to vector<8xf32>
    %166 = vector.shape_cast %165 : vector<8xf32> to vector<8x1xf32>
    %cst_82 = arith.constant 3.200000e+01 : f32
    %167 = vector.broadcast %cst_82 : f32 to vector<8x1xf32>
    %168 = arith.divf %166, %167 : vector<8x1xf32>
    %169 = vector.broadcast %168 : vector<8x1xf32> to vector<8x32xf32>
    %170 = arith.subf %160, %169 : vector<8x32xf32>
    %171 = arith.mulf %170, %170 : vector<8x32xf32>
    %cst_83 = arith.constant dense<0.000000e+00> : vector<8xf32>
    %172 = vector.multi_reduction <add>, %171, %cst_83 [1] : vector<8x32xf32> to vector<8xf32>
    %173 = vector.shape_cast %172 : vector<8xf32> to vector<8x1xf32>
    %cst_84 = arith.constant 3.200000e+01 : f32
    %174 = vector.broadcast %cst_84 : f32 to vector<8x1xf32>
    %175 = arith.divf %173, %174 : vector<8x1xf32>
    %176 = vector.broadcast %168 : vector<8x1xf32> to vector<8x32xf32>
    %177 = arith.subf %160, %176 : vector<8x32xf32>
    %cst_85 = arith.constant 9.99999974E-6 : f32
    %178 = vector.broadcast %cst_85 : f32 to vector<8x1xf32>
    %179 = arith.addf %175, %178 : vector<8x1xf32>
    %180 = math.rsqrt %179 : vector<8x1xf32>
    %181 = vector.broadcast %180 : vector<8x1xf32> to vector<8x32xf32>
    %182 = arith.mulf %177, %181 : vector<8x32xf32>
    %183 = vector.broadcast %162 : vector<1x32xf32> to vector<8x32xf32>
    %184 = arith.mulf %182, %183 : vector<8x32xf32>
    %185 = vector.broadcast %164 : vector<1x32xf32> to vector<8x32xf32>
    %186 = arith.addf %184, %185 : vector<8x32xf32>
    %c0_86 = arith.constant 0 : index
    %c0_87 = arith.constant 0 : index
    %187 = vector.load %arg20[%c0_86, %c0_87] : memref<8x32xf32, #tpu.memory_space<vmem>>, vector<8x32xf32>
    tpu.vector_store %arg20[%c0_86, %c0_87], %186 {strides = array<i32>} : memref<8x32xf32, #tpu.memory_space<vmem>>, vector<8x32xf32>,
    %c1_i32 = arith.constant 1 : i32
    %188 = arith.cmpi eq, %arg1, %c1_i32 : i32
    %189 = arith.extui %188 : i1 to i32
    %c0_i32_88 = arith.constant 0 : i32
    %190 = arith.cmpi ne, %189, %c0_i32_88 : i32
    scf.if %190 {
      %c0_89 = arith.constant 0 : index
      %c0_90 = arith.constant 0 : index
      %191 = vector.load %arg17[%c0_89, %c0_90] : memref<1x32xf32, #tpu.memory_space<vmem>>, vector<1x32xf32>
      %c0_91 = arith.constant 0 : index
      %c0_92 = arith.constant 0 : index
      %192 = vector.load %arg18[%c0_91, %c0_92] : memref<1x32xf32, #tpu.memory_space<vmem>>, vector<1x32xf32>
      %cst_93 = arith.constant dense<0.000000e+00> : vector<8xf32>
      %193 = vector.multi_reduction <add>, %186, %cst_93 [1] : vector<8x32xf32> to vector<8xf32>
      %194 = vector.shape_cast %193 : vector<8xf32> to vector<8x1xf32>
      %cst_94 = arith.constant 3.200000e+01 : f32
      %195 = vector.broadcast %cst_94 : f32 to vector<8x1xf32>
      %196 = arith.divf %194, %195 : vector<8x1xf32>
      %197 = vector.broadcast %196 : vector<8x1xf32> to vector<8x32xf32>
      %198 = arith.subf %186, %197 : vector<8x32xf32>
      %199 = arith.mulf %198, %198 : vector<8x32xf32>
      %cst_95 = arith.constant dense<0.000000e+00> : vector<8xf32>
      %200 = vector.multi_reduction <add>, %199, %cst_95 [1] : vector<8x32xf32> to vector<8xf32>
      %201 = vector.shape_cast %200 : vector<8xf32> to vector<8x1xf32>
      %cst_96 = arith.constant 3.200000e+01 : f32
      %202 = vector.broadcast %cst_96 : f32 to vector<8x1xf32>
      %203 = arith.divf %201, %202 : vector<8x1xf32>
      %204 = vector.broadcast %196 : vector<8x1xf32> to vector<8x32xf32>
      %205 = arith.subf %186, %204 : vector<8x32xf32>
      %cst_97 = arith.constant 9.99999974E-6 : f32
      %206 = vector.broadcast %cst_97 : f32 to vector<8x1xf32>
      %207 = arith.addf %203, %206 : vector<8x1xf32>
      %208 = math.rsqrt %207 : vector<8x1xf32>
      %209 = vector.broadcast %208 : vector<8x1xf32> to vector<8x32xf32>
      %210 = arith.mulf %205, %209 : vector<8x32xf32>
      %211 = vector.broadcast %191 : vector<1x32xf32> to vector<8x32xf32>
      %212 = arith.mulf %210, %211 : vector<8x32xf32>
      %213 = vector.broadcast %192 : vector<1x32xf32> to vector<8x32xf32>
      %214 = arith.addf %212, %213 : vector<8x32xf32>
      %c0_98 = arith.constant 0 : index
      %c0_99 = arith.constant 0 : index
      %c0_100 = arith.constant 0 : index
      %215 = vector.load %arg19[%c0_98, %c0_99, %c0_100] : memref<1x8x32xf32, #tpu.memory_space<vmem>>, vector<1x8x32xf32>
      %216 = vector.shape_cast %215 : vector<1x8x32xf32> to vector<8x32xf32>
      %217 = vector.shape_cast %214 : vector<8x32xf32> to vector<1x8x32xf32>
      tpu.vector_store %arg19[%c0_98, %c0_99, %c0_100], %217 {strides = array<i32>} : memref<1x8x32xf32, #tpu.memory_space<vmem>>, vector<1x8x32xf32>,
    } else {
    }
    return
  }
  func.func @transform_0(%arg0: i32, %arg1: i32) -> (i32, i32, i32) {
    %c0_i32 = arith.constant 0 : i32
    %c0_i32_0 = arith.constant 0 : i32
    %c0_i32_1 = arith.constant 0 : i32
    return %arg0, %c0_i32, %c0_i32_0 : i32, i32, i32
  }
  func.func @transform_1(%arg0: i32, %arg1: i32) -> (i32, i32) {
    %c0_i32 = arith.constant 0 : i32
    %c0_i32_0 = arith.constant 0 : i32
    %c0_i32_1 = arith.constant 0 : i32
    return %c0_i32, %c0_i32_0 : i32, i32
  }
  func.func @transform_2(%arg0: i32, %arg1: i32) -> (i32, i32) {
    %c0_i32 = arith.constant 0 : i32
    %c0_i32_0 = arith.constant 0 : i32
    %c0_i32_1 = arith.constant 0 : i32
    return %c0_i32, %c0_i32_0 : i32, i32
  }
  func.func @transform_3(%arg0: i32, %arg1: i32) -> (i32, i32, i32) {
    %c0_i32 = arith.constant 0 : i32
    %c0_i32_0 = arith.constant 0 : i32
    %c0_i32_1 = arith.constant 0 : i32
    return %arg1, %c0_i32, %c0_i32_0 : i32, i32, i32
  }
  func.func @transform_4(%arg0: i32, %arg1: i32) -> (i32, i32, i32) {
    %c0_i32 = arith.constant 0 : i32
    %c0_i32_0 = arith.constant 0 : i32
    %c0_i32_1 = arith.constant 0 : i32
    return %arg1, %c0_i32, %c0_i32_0 : i32, i32, i32
  }
  func.func @transform_5(%arg0: i32, %arg1: i32) -> (i32, i32, i32) {
    %c0_i32 = arith.constant 0 : i32
    %c0_i32_0 = arith.constant 0 : i32
    %c0_i32_1 = arith.constant 0 : i32
    return %arg1, %c0_i32, %c0_i32_0 : i32, i32, i32
  }
  func.func @transform_6(%arg0: i32, %arg1: i32) -> (i32, i32, i32) {
    %c0_i32 = arith.constant 0 : i32
    %c0_i32_0 = arith.constant 0 : i32
    %c0_i32_1 = arith.constant 0 : i32
    return %arg1, %c0_i32, %c0_i32_0 : i32, i32, i32
  }
  func.func @transform_7(%arg0: i32, %arg1: i32) -> (i32, i32, i32) {
    %c0_i32 = arith.constant 0 : i32
    %c0_i32_0 = arith.constant 0 : i32
    %c0_i32_1 = arith.constant 0 : i32
    return %arg1, %c0_i32, %c0_i32_0 : i32, i32, i32
  }
  func.func @transform_8(%arg0: i32, %arg1: i32) -> (i32, i32, i32) {
    %c0_i32 = arith.constant 0 : i32
    %c0_i32_0 = arith.constant 0 : i32
    %c0_i32_1 = arith.constant 0 : i32
    return %arg1, %c0_i32, %c0_i32_0 : i32, i32, i32
  }
  func.func @transform_9(%arg0: i32, %arg1: i32) -> (i32, i32, i32) {
    %c0_i32 = arith.constant 0 : i32
    %c0_i32_0 = arith.constant 0 : i32
    %c0_i32_1 = arith.constant 0 : i32
    return %arg1, %c0_i32, %c0_i32_0 : i32, i32, i32
  }
  func.func @transform_10(%arg0: i32, %arg1: i32) -> (i32, i32, i32) {
    %c0_i32 = arith.constant 0 : i32
    %c0_i32_0 = arith.constant 0 : i32
    %c0_i32_1 = arith.constant 0 : i32
    return %arg1, %c0_i32, %c0_i32_0 : i32, i32, i32
  }
  func.func @transform_11(%arg0: i32, %arg1: i32) -> (i32, i32, i32) {
    %c0_i32 = arith.constant 0 : i32
    %c0_i32_0 = arith.constant 0 : i32
    %c0_i32_1 = arith.constant 0 : i32
    return %arg1, %c0_i32, %c0_i32_0 : i32, i32, i32
  }
  func.func @transform_12(%arg0: i32, %arg1: i32) -> (i32, i32, i32) {
    %c0_i32 = arith.constant 0 : i32
    %c0_i32_0 = arith.constant 0 : i32
    %c0_i32_1 = arith.constant 0 : i32
    return %arg1, %c0_i32, %c0_i32_0 : i32, i32, i32
  }
  func.func @transform_13(%arg0: i32, %arg1: i32) -> (i32, i32, i32) {
    %c0_i32 = arith.constant 0 : i32
    %c0_i32_0 = arith.constant 0 : i32
    %c0_i32_1 = arith.constant 0 : i32
    return %arg1, %c0_i32, %c0_i32_0 : i32, i32, i32
  }
  func.func @transform_14(%arg0: i32, %arg1: i32) -> (i32, i32, i32) {
    %c0_i32 = arith.constant 0 : i32
    %c0_i32_0 = arith.constant 0 : i32
    %c0_i32_1 = arith.constant 0 : i32
    return %arg1, %c0_i32, %c0_i32_0 : i32, i32, i32
  }
  func.func @transform_15(%arg0: i32, %arg1: i32) -> (i32, i32) {
    %c0_i32 = arith.constant 0 : i32
    %c0_i32_0 = arith.constant 0 : i32
    %c0_i32_1 = arith.constant 0 : i32
    return %c0_i32, %c0_i32_0 : i32, i32
  }
  func.func @transform_16(%arg0: i32, %arg1: i32) -> (i32, i32) {
    %c0_i32 = arith.constant 0 : i32
    %c0_i32_0 = arith.constant 0 : i32
    %c0_i32_1 = arith.constant 0 : i32
    return %c0_i32, %c0_i32_0 : i32, i32
  }
  func.func @transform_17(%arg0: i32, %arg1: i32) -> (i32, i32, i32) {
    %c0_i32 = arith.constant 0 : i32
    %c0_i32_0 = arith.constant 0 : i32
    %c0_i32_1 = arith.constant 0 : i32
    return %arg0, %c0_i32, %c0_i32_0 : i32, i32, i32
  }
}

</mosaic_0001>

<bundles_post_ra>
// kernel: encoder_forward.1
= control target key start
LH: loop header
LB: loop body
LE: loop exit
PB: predicated region body
PF: predicated region fallthrough
CT: control target
= control target key end

     0   :  { %s4064_s0 = inlined_call_operand.vmem [shape: f32[2,8,16], index: 0, kind: input, shape index: {}]   ;;  %s4065_s1 = inlined_call_operand.hbm [shape: f32[16,32], index: 1, kind: input, shape index: {}]   ;;  %s4066_s2 = inlined_call_operand.hbm [shape: f32[1,32], index: 2, kind: input, shape index: {}]   ;;  %s4067_s3 = inlined_call_operand.vmem [shape: f32[2,32,96], index: 3, kind: input, shape index: {}]   ;;  %s4068_s4 = inlined_call_operand.vmem [shape: f32[2,32,32], index: 4, kind: input, shape index: {}]   ;;  %s4069_s5 = inlined_call_operand.vmem [shape: f32[2,1,32], index: 5, kind: input, shape index: {}]   ;;  %s4070_s6 = inlined_call_operand.hbm [shape: f32[2,1,32], index: 6, kind: input, shape index: {}]   ;;  %s4071_s7 = inlined_call_operand.hbm [shape: f32[2,1,32], index: 7, kind: input, shape index: {}]   ;;  %s4072_s8 = inlined_call_operand.hbm [shape: f32[2,1,32], index: 8, kind: input, shape index: {}]   ;;  %s4073_s9 = inlined_call_operand.vmem [shape: f32[2,32,64], index: 9, kind: input, shape index: {}]   ;;  %s4074_s10 = inlined_call_operand.hbm [shape: f32[2,1,64], index: 10, kind: input, shape index: {}]   ;;  %s4075_s11 = inlined_call_operand.vmem [shape: f32[2,64,32], index: 11, kind: input, shape index: {}]   ;;  %s4076_s12 = inlined_call_operand.hbm [shape: f32[2,1,32], index: 12, kind: input, shape index: {}]   ;;  %s4077_s13 = inlined_call_operand.hbm [shape: f32[2,1,32], index: 13, kind: input, shape index: {}]   ;;  %s4078_s14 = inlined_call_operand.hbm [shape: f32[2,1,32], index: 14, kind: input, shape index: {}]   ;;  %s4079_s15 = inlined_call_operand.vmem [shape: f32[1,32], index: 15, kind: input, shape index: {}]   ;;  %s4080_s16 = inlined_call_operand.vmem [shape: f32[1,32], index: 16, kind: input, shape index: {}]   ;;  %s4081_s17 = inlined_call_operand.hbm [shape: f32[2,8,32], index: 17, kind: output, shape index: {}]  }
   0x1   :  { %4103 = sst [smem:[#allocation34_spill]] %s4064_s0 }
   0x2   :  { %4104 = sst [smem:[#allocation35_spill]] %s4065_s1 }
   0x3   :  { %4105 = sst [smem:[#allocation36_spill]] %s4066_s2 }
   0x4   :  { %4106 = sst [smem:[#allocation37_spill]] %s4067_s3 }
   0x5   :  { %4107 = sst [smem:[#allocation38_spill]] %s4068_s4 }
   0x6   :  { %4108 = sst [smem:[#allocation39_spill]] %s4069_s5 }
   0x7   :  { %4109 = sst [smem:[#allocation40_spill]] %s4070_s6 }
   0x8   :  { %4110 = sst [smem:[#allocation41_spill]] %s4071_s7 }
   0x9   :  { %4111 = sst [smem:[#allocation42_spill]] %s4072_s8 }
   0xa   :  { %4112 = sst [smem:[#allocation43_spill]] %s4073_s9 }
   0xb   :  { %4113 = sst [smem:[#allocation44_spill]] %s4074_s10 }
   0xc   :  { %4114 = sst [smem:[#allocation45_spill]] %s4075_s11 }
   0xd   :  { %4115 = sst [smem:[#allocation46_spill]] %s4076_s12 }
   0xe   :  { %4116 = sst [smem:[#allocation47_spill]] %s4077_s13 }
   0xf   :  { %4117 = sst [smem:[#allocation48_spill]] %s4078_s14 }
  0x10   :  { %4118 = sst [smem:[#allocation49_spill]] %s4079_s15 }
  0x11   :  { %4119 = sst [smem:[#allocation50_spill]] %s4080_s16 }
  0x12   :  { %4120 = sst [smem:[#allocation51_spill]] %s4081_s17 }
  0x13   :  { %22 = vsyncpa [#allocation4], 0 }
  0x14   :  { %23 = vsyncpa [#allocation7], 0 }
  0x15   :  { %24 = vsyncpa [#allocation5], 0 }
  0x16   :  { %26 = vsyncpa [#allocation5 + $0x1], 0  ;;  %s3518_s24 = smov 0   ;;  %s3520_s25 = smov 0  }
  0x17   :  { %s3522_s26 = smov 0   ;;  %s3524_s27 = smov 0  }
  0x18   :  { %s3526_s28 = smov 0   ;;  %s3528_s29 = smov 0  }
  0x19   :  { %s3530_s0 = smov 0   ;;  %s3532_s30 = smov 0  }
  0x1a   :  { %s3534_s18 = smov 0   ;;  %s3536_s19 = smov 0  }
  0x1b   :  { %s3538_s1 = smov 0  }
  0x1c LB: > { %4121 = sst [smem:[#allocation20_spill]] %s3359_s24  ;;  %s3572_s20 = sadd.s32 4294967295, %s3399_s1   ;;  %s3399_s1 = sphi %s3538_s1, %s32_s1   ;;  %s3395_s19 = sphi %s3536_s19, %s4191_s19   ;;  %s3391_s18 = sphi %s3534_s18, %s4190_s18   ;;  %s3387_s30 = sphi %s3532_s30, %s4189_s30   ;;  %s3383_s0 = sphi %s3530_s0, %s4197_s0   ;;  %s3379_s29 = sphi %s3528_s29, %s4196_s29   ;;  %s3375_s28 = sphi %s3526_s28, %s4195_s28   ;;  %s3371_s27 = sphi %s3524_s27, %s4194_s27   ;;  %s3367_s26 = sphi %s3522_s26, %s4193_s26   ;;  %s3363_s25 = sphi %s3520_s25, %s4192_s25   ;;  %s3359_s24 = sphi %s3518_s24, %s4184_s24  }
  0x1d   : > { %4122 = sst [smem:[#allocation21_spill]] %s3363_s25  ;;  %s2609_s21 = sadd.s32 4294967294, %s3399_s1  }
  0x1e   : > { %4123 = sst [smem:[#allocation22_spill]] %s3379_s29  ;;  %p204_p0 = scmp.ne.s32.totalorder %s3379_s29, %s3375_s28 }
  0x1f   : > { %4124 = sst [smem:[#allocation23_spill]] %s3383_s0  ;;  %p205_p1 = scmp.eq.s32.totalorder %s3399_s1, 0 }
  0x20   : > { %4125 = sst [smem:[#allocation24_spill]] %s3387_s30  ;;  %p210_p2 = scmp.ne.s32.totalorder %s3375_s28, %s3371_s27 }
  0x21   : > { %4126 = sst [smem:[#allocation25_spill]] %s3391_s18  ;;  %p4085_p3 = scmp.eq.s32.totalorder %s3572_s20, 0 }
  0x22   : > { %4127 = sst [smem:[#allocation26_spill]] %s3395_s19  ;;  %p3582_p4 = por %p205_p1, %p204_p0 }
  0x23   : > { %4128 = sst [smem:[#allocation27_spill]] %s3399_s1  ;;  %p483_p5 = scmp.ne.s32.totalorder %s3367_s26, %s3363_s25 }
  0x24   : > { %p3590_p6 = por %p4085_p3, %p210_p2  ;;  %p484_p7 = scmp.eq.s32.totalorder %s3572_s20, 3 }
  0x25   : > { %p489_p8 = scmp.ne.s32.totalorder %s3363_s25, %s3359_s24  ;;  %p490_p9 = scmp.eq.s32.totalorder %s2609_s21, 3 }
  0x26   : > { %s4130_s16 = scalar_select %p3590_p6, 1, 0 }
  0x27   : > { %p3597_p10 = por %p484_p7, %p483_p5  ;;  %p2610_p11 = scmp.ge.s32.totalorder %s3399_s1, 1 }
  0x28   : > { %4131 = sst [smem:[#allocation28_spill]] %s4130_s16  ;;  %p3602_p12 = por %p490_p9, %p489_p8 }
  0x29   : > { %s4132_s27 = scalar_select %p3597_p10, 1, 0 }
  0x2a   : > { %s4134_s23 = scalar_select %p3602_p12, 1, 0 }
  0x2b   : > { %4133 = sst [smem:[#allocation29_spill]] %s4132_s27  ;;  %p497_p13 = scmp.lt.s32.totalorder %s3399_s1, 5 }
  0x2c   : > { %4135 = sst [smem:[#allocation30_spill]] %s4134_s23  ;;  %s3401_s15 = smov [#allocation3]  }
  0x2d   : > { %p3607_p0 = pnand %p2610_p11, %p497_p13  ;;  %s509_s11 = sshll.u32 %s3401_s15, 4  ;;  %s510_s11 = int_to_ptr.vmem [resolvable:$true] %s509_s11 }
  0x2e   : > { %p2888_p2 = scmp.lt.s32.totalorder %s3399_s1, 4  ;;  %s3034_s24 = scalar_lea.vmem %s510_s11, 256 }
  0x2f   : > { %p2853_p1 = pneg %p3607_p0  ;;  %p3035_p9 = scmp.ne.s32.totalorder %s510_s11, %s3034_s24 }
  0x30   : > { %p3622_p7 = pnand %p2888_p2, %p3582_p4  ;;  %p3042_p12 = scmp.lt.s32.totalorder %s510_s11, %s510_s11 }
  0x31   : > { %p3616_p5 = pnand %p2853_p1, %p4085_p3  ;;  %p3043_p1 = scmp.lt.s32.totalorder %s3034_s24, %s3034_s24 }
  0x33   : > { %p3025_p8 = pneg %p3616_p5  ;;  %p3044_p3 = por %p3043_p1, %p3042_p12 }
  0x35   : > { %p3037_p11 = pnand %p3035_p9, %p3025_p8 }
  0x37   : > { %p3038_p13 = pneg %p3037_p11 }
  0x39   : > { %p3045_p10 = pnand %p3044_p3, %p3038_p13 }
  0x3b   : > { %3048 = shalt.err (!%p3045_p10)
}
  0x3c   : > { %s3402_s15 = smov 128   ;;  %s3403_s17 = smov 8  }
  0x3d   : > { %s4139_s5 = sld [smem:[#allocation35_spill]]  ;;  %s41_s24 = sadd.s32 1, %s3391_s18 }
  0x3e   : > { %s44_s4 = sadd.s32 1, %s3395_s19  ;;  %p42_p3 = scmp.ge.s32.totalorder %s41_s24, 2 }
  0x3f   : > { %s569_s3 = sand.u32 1, %s3399_s1   ;;  %s3640_s0 = sand.u32 1, %s3379_s29  }
  0x40   : > { %s4199_s24 = smov (%p42_p3, %s41_s24), 0  ;;  %s4201_s4 = smov (!%p42_p3, %s44_s4), %s3395_s19 }
  0x41   : > { %4140 = sst [smem:[#allocation31_spill]] %s4199_s24  ;;  %s194_s30 = ssub.s32 %s3391_s18, %s4199_s24 }
  0x42   : > { %p46_p4 = scmp.ge.s32.totalorder %s4201_s4, 2  ;;  %p195_p10 = scmp.eq.s32.totalorder %s194_s30, 0 }
  0x43   : > { %2856 = dma.hbm_to_vmem [thread:$0]  (!%p3616_p5), %s4139_s5, 256, %s510_s11, [#allocation4], %s3402_s15, %s3402_s15, %s3403_s17  }
  0x44   : > { %s3648_s9 = sshll.u32 %s3391_s18, 4  ;;  %s572_s5 = scalar_lea.vmem [#allocation8], %s3640_s0 }
  0x45   : > { %s579_s11 = sshll.u32 %s572_s5, 4  ;;  %s4203_s4 = smov (%p46_p4, %s4201_s4), 0  ;;  %s580_s11 = int_to_ptr.vmem [resolvable:$true] %s579_s11 }
  0x46   : > { %4141 = sst [smem:[#allocation32_spill]] %s4203_s4  ;;  %s4142_s27 = sadd.s32 1, %s3379_s29 }
  0x47   : > { %s3656_s15 = scalar_select %p195_p10, %s3379_s29, %s4142_s27  }
  0x48   : > { %s470_s17 = ssub.s32 %s3395_s19, %s4203_s4  ;;  %s4144_s6 = sld [smem:[#allocation40_spill]] }
  0x49   : > { %4143 = sst [smem:[#allocation33_spill]] %s3656_s15  ;;  %p3664_p12 = scmp.eq.s32.totalorder %s470_s17, 0 }
  0x4a   : > { %s3668_s30 = scalar_lea.sflag [#allocation4], %s569_s3  ;;  %p3672_p2 = pneg %p3622_p7 }
  0x4b   : > { %s3062_s27 = scalar_lea.vmem %s580_s11, 16  ;;  %s3404_s25 = smov [#allocation8]  }
  0x4c   : > { %p3063_p9 = scmp.ne.s32.totalorder %s580_s11, %s3062_s27  ;;  %s3067_s1 = sshll.u32 %s3404_s25, 4  ;;  %s3068_s1 = int_to_ptr.vmem [resolvable:$false] %s3067_s1 }
  0x4d   : > { %s3069_s17 = scalar_lea.vmem %s3068_s1, 32  ;;  %p3070_p1 = scmp.lt.s32.totalorder %s580_s11, %s3068_s1 }
  0x4e   : > { %s577_s16 = scalar_lea.hbm %s4144_s6, %s3648_s9  ;;  %p3065_p11 = pnand %p3063_p9, %p3672_p2 }
  0x4f   : > { %p3071_p3 = scmp.lt.s32.totalorder %s3069_s17, %s3062_s27 }
  0x50   : > { %p3066_p13 = pneg %p3065_p11 }
  0x51   : > { %p3072_p4 = por %p3071_p3, %p3070_p1 }
  0x53   : > { %p3073_p10 = pnand %p3072_p4, %p3066_p13 }
  0x55   : > { %3076 = shalt.err (!%p3073_p10)
}
  0x56   : > { %2863 = dma.hbm_to_vmem [thread:$0]  (!%p3622_p7), %s577_s16, 16, %s580_s11, %s3668_s30  }
  0x57   : > { %s4147_s3 = sadd.s32 1, %s3367_s26  ;;  %s4148_s7 = sld [smem:[#allocation41_spill]] }
  0x58   : > { %s3686_s25 = scalar_select %p3664_p12, %s3367_s26, %s4147_s3  }
  0x59   : > { %s589_s6 = scalar_lea.vmem [#allocation9], %s3640_s0  ;;  %s4149_s8 = sld [smem:[#allocation42_spill]] }
  0x5a   : > { %s596_s4 = sshll.u32 %s589_s6, 4  ;;  %s3405_s16 = smov [#allocation9]   ;;  %s597_s4 = int_to_ptr.vmem [resolvable:$true] %s596_s4 }
  0x5b   : > { %s3090_s29 = scalar_lea.vmem %s597_s4, 16  ;;  %s3095_s24 = sshll.u32 %s3405_s16, 4  ;;  %s3096_s24 = int_to_ptr.vmem [resolvable:$false] %s3095_s24 }
  0x5c   : > { %p3091_p9 = scmp.ne.s32.totalorder %s597_s4, %s3090_s29  ;;  %s3097_s11 = scalar_lea.vmem %s3096_s24, 32 }
  0x5d   : > { %s594_s17 = scalar_lea.hbm %s4148_s7, %s3648_s9  ;;  %p3098_p12 = scmp.lt.s32.totalorder %s597_s4, %s3096_s24 }
  0x5e   : > { %p3093_p11 = pnand %p3091_p9, %p3672_p2  ;;  %p3099_p1 = scmp.lt.s32.totalorder %s3097_s11, %s3090_s29 }
  0x5f   : > { %s611_s15 = scalar_lea.hbm %s4149_s8, %s3648_s9 }
  0x60   : > { %p3094_p13 = pneg %p3093_p11  ;;  %p3100_p3 = por %p3099_p1, %p3098_p12 }
  0x62   : > { %p3101_p4 = pnand %p3100_p3, %p3094_p13 }
  0x64   : > { %3104 = shalt.err (!%p3101_p4)
}
  0x65   : > { %2866 = dma.hbm_to_vmem [thread:$0]  (!%p3622_p7), %s594_s17, 16, %s597_s4, %s3668_s30  }
  0x66   : > { %s606_s6 = scalar_lea.vmem [#allocation10], %s3640_s0  ;;  %s4150_s10 = sld [smem:[#allocation44_spill]] }
  0x67   : > { %s613_s18 = sshll.u32 %s606_s6, 4  ;;  %s3406_s29 = smov [#allocation10]   ;;  %s614_s18 = int_to_ptr.vmem [resolvable:$true] %s613_s18 }
  0x68   : > { %s3118_s27 = scalar_lea.vmem %s614_s18, 16  ;;  %s3123_s16 = sshll.u32 %s3406_s29, 4  ;;  %s3124_s16 = int_to_ptr.vmem [resolvable:$false] %s3123_s16 }
  0x69   : > { %p3119_p10 = scmp.ne.s32.totalorder %s614_s18, %s3118_s27  ;;  %s3125_s24 = scalar_lea.vmem %s3124_s16, 32 }
  0x6a   : > { %p3126_p13 = scmp.lt.s32.totalorder %s614_s18, %s3124_s16  ;;  %p3127_p12 = scmp.lt.s32.totalorder %s3125_s24, %s3118_s27 }
  0x6b   : > { %p3121_p9 = pnand %p3119_p10, %p3672_p2 }
  0x6c   : > { %s636_s1 = scalar_lea.hbm %s4150_s10, %s3648_s9  ;;  %p3128_p1 = por %p3127_p12, %p3126_p13 }
  0x6d   : > { %p3122_p11 = pneg %p3121_p9 }
  0x6f   : > { %p3129_p3 = pnand %p3128_p1, %p3122_p11 }
  0x71   : > { %3132 = shalt.err (!%p3129_p3)
}
  0x72   : > { %2869 = dma.hbm_to_vmem [thread:$0]  (!%p3622_p7), %s611_s15, 16, %s614_s18, %s3668_s30  }
  0x73   : > { %s631_s11 = scalar_lea.vmem [#allocation11], %s3640_s0  ;;  %s4151_s12 = sld [smem:[#allocation46_spill]] }
  0x74   : > { %s638_s6 = sshll.u32 %s631_s11, 4  ;;  %s3407_s16 = smov [#allocation11]   ;;  %s639_s6 = int_to_ptr.vmem [resolvable:$true] %s638_s6 }
  0x75   : > { %s3146_s29 = scalar_lea.vmem %s639_s6, 16  ;;  %s3151_s24 = sshll.u32 %s3407_s16, 4  ;;  %s3152_s24 = int_to_ptr.vmem [resolvable:$false] %s3151_s24 }
  0x76   : > { %p3147_p4 = scmp.ne.s32.totalorder %s639_s6, %s3146_s29  ;;  %s3153_s4 = scalar_lea.vmem %s3152_s24, 32 }
  0x77   : > { %p3154_p11 = scmp.lt.s32.totalorder %s639_s6, %s3152_s24  ;;  %p3155_p13 = scmp.lt.s32.totalorder %s3153_s4, %s3146_s29 }
  0x78   : > { %p3149_p10 = pnand %p3147_p4, %p3672_p2 }
  0x79   : > { %s661_s27 = scalar_lea.hbm %s4151_s12, %s3648_s9  ;;  %p3156_p12 = por %p3155_p13, %p3154_p11 }
  0x7a   : > { %p3150_p9 = pneg %p3149_p10 }
  0x7c   : > { %p3157_p1 = pnand %p3156_p12, %p3150_p9 }
  0x7e   : > { %3160 = shalt.err (!%p3157_p1)
}
  0x7f   : > { %2872 = dma.hbm_to_vmem [thread:$0]  (!%p3622_p7), %s636_s1, 16, %s639_s6, %s3668_s30  }
  0x80   : > { %s656_s17 = scalar_lea.vmem [#allocation12], %s3640_s0  ;;  %s4152_s13 = sld [smem:[#allocation47_spill]] }
  0x81   : > { %s663_s11 = sshll.u32 %s656_s17, 4  ;;  %s3408_s24 = smov [#allocation12]   ;;  %s664_s11 = int_to_ptr.vmem [resolvable:$true] %s663_s11 }
  0x82   : > { %s3174_s16 = scalar_lea.vmem %s664_s11, 16  ;;  %s3179_s4 = sshll.u32 %s3408_s24, 4  ;;  %s3180_s4 = int_to_ptr.vmem [resolvable:$false] %s3179_s4 }
  0x83   : > { %p3175_p3 = scmp.ne.s32.totalorder %s664_s11, %s3174_s16  ;;  %s3181_s15 = scalar_lea.vmem %s3180_s4, 32 }
  0x84   : > { %p3182_p9 = scmp.lt.s32.totalorder %s664_s11, %s3180_s4  ;;  %p3183_p11 = scmp.lt.s32.totalorder %s3181_s15, %s3174_s16 }
  0x85   : > { %p3177_p4 = pnand %p3175_p3, %p3672_p2 }
  0x86   : > { %s678_s29 = scalar_lea.hbm %s4152_s13, %s3648_s9  ;;  %p3184_p13 = por %p3183_p11, %p3182_p9 }
  0x87   : > { %p3178_p10 = pneg %p3177_p4 }
  0x89   : > { %p3185_p12 = pnand %p3184_p13, %p3178_p10 }
  0x8b   : > { %3188 = shalt.err (!%p3185_p12)
}
  0x8c   : > { %2875 = dma.hbm_to_vmem [thread:$0]  (!%p3622_p7), %s661_s27, 16, %s664_s11, %s3668_s30  }
  0x8d   : > { %s673_s18 = scalar_lea.vmem [#allocation13], %s3640_s0  ;;  %s3409_s19 = smov [#allocation6]  }
  0x8e   : > { %s680_s17 = sshll.u32 %s673_s18, 4  ;;  %s523_s3 = sshll.u32 %s3409_s19, 4  ;;  %s681_s17 = int_to_ptr.vmem [resolvable:$true] %s680_s17  ;;  %s524_s3 = int_to_ptr.vmem [resolvable:$true] %s523_s3 }
  0x8f   : > { %s3202_s16 = scalar_lea.vmem %s681_s17, 16  ;;  %s3410_s24 = smov [#allocation13]  }
  0x90   : > { %p3203_p1 = scmp.ne.s32.totalorder %s681_s17, %s3202_s16  ;;  %s3207_s4 = sshll.u32 %s3410_s24, 4  ;;  %s3208_s4 = int_to_ptr.vmem [resolvable:$false] %s3207_s4 }
  0x91   : > { %s3209_s15 = scalar_lea.vmem %s3208_s4, 32  ;;  %p3210_p10 = scmp.lt.s32.totalorder %s681_s17, %s3208_s4 }
  0x92   : > { %p3205_p3 = pnand %p3203_p1, %p3672_p2  ;;  %p3211_p9 = scmp.lt.s32.totalorder %s3209_s15, %s3202_s16 }
  0x94   : > { %p3206_p4 = pneg %p3205_p3  ;;  %p3212_p11 = por %p3211_p9, %p3210_p10 }
  0x96   : > { %p3213_p13 = pnand %p3212_p11, %p3206_p4 }
  0x98   : > { %3216 = shalt.err (!%p3213_p13)
}
  0x99   : > { %2878 = dma.hbm_to_vmem [thread:$0]  (!%p3622_p7), %s678_s29, 16, %s681_s17, %s3668_s30  }
  0x9a   : > { %s3228_s1 = scalar_lea.vmem %s524_s3, 16  ;;  %s3235_s6 = scalar_lea.vmem %s524_s3, 32 }
  0x9b   : > { %p3229_p12 = scmp.ne.s32.totalorder %s524_s3, %s3228_s1  ;;  %p3236_p4 = scmp.lt.s32.totalorder %s524_s3, %s524_s3 }
  0x9c   : > { %p3237_p10 = scmp.lt.s32.totalorder %s3235_s6, %s3228_s1 }
  0x9d   : > { %p3231_p1 = pnand %p3229_p12, %p3025_p8 }
  0x9e   : > { %p3238_p9 = por %p3237_p10, %p3236_p4 }
  0x9f   : > { %p3232_p3 = pneg %p3231_p1 }
  0xa1   : > { %p3239_p11 = pnand %p3238_p9, %p3232_p3 }
  0xa3   : > { %3242 = shalt.err (!%p3239_p11)
}
  0xa4   : > { %s4153_s2 = sld [smem:[#allocation36_spill]]  ;;  %s690_s24 = scalar_lea.vmem [#allocation14], %s3640_s0 }
  0xa5   : > { %s4154_s14 = sld [smem:[#allocation48_spill]]  ;;  %s697_s4 = sshll.u32 %s690_s24, 4  ;;  %s698_s4 = int_to_ptr.vmem [resolvable:$true] %s697_s4 }
  0xa6   : > { %s3256_s15 = scalar_lea.vmem %s698_s4, 16  ;;  %s3411_s21 = smov [#allocation14]  }
  0xa7   : > { %p3257_p8 = scmp.ne.s32.totalorder %s698_s4, %s3256_s15  ;;  %s3261_s27 = sshll.u32 %s3411_s21, 4  ;;  %s3262_s27 = int_to_ptr.vmem [resolvable:$false] %s3261_s27 }
  0xa8   : > { %s3263_s11 = scalar_lea.vmem %s3262_s27, 32  ;;  %p3264_p1 = scmp.lt.s32.totalorder %s698_s4, %s3262_s27 }
  0xa9   : > { %p3259_p13 = pnand %p3257_p8, %p3672_p2  ;;  %p3265_p3 = scmp.lt.s32.totalorder %s3263_s11, %s3256_s15 }
  0xaa   : > { %2859 = dma.hbm_to_vmem [thread:$0]  (!%p3616_p5), %s4153_s2, 16, %s524_s3, [#allocation7]  }
  0xab   : > { %s695_s16 = scalar_lea.hbm %s4154_s14, %s3648_s9  ;;  %p3260_p12 = pneg %p3259_p13 }
  0xac   : > { %p3266_p4 = por %p3265_p3, %p3264_p1 }
  0xae   : > { %p3267_p5 = pnand %p3266_p4, %p3260_p12 }
  0xb0   : > { %3270 = shalt.err (!%p3267_p5)
}
  0xb1   : > { %2881 = dma.hbm_to_vmem [thread:$0]  (!%p3622_p7), %s695_s16, 16, %s698_s4, %s3668_s30  }
  0xb2   : > { %706 = sbr.rel (%p3607_p0) target bundleno = 4510 (0x119e), region = 88  ;;  %p4155_p10 = scmp.eq.s32.totalorder (!%p3607_p0), %s3572_s20, 0 }
  0xb7   : > { %3342 = dma.done.wait (%p4155_p10), [#allocation4], 256   ;;  %p4156_p2 = pmov %p4155_p10 }
  0xb9   : > { %3344 = vsyncadd (%p4156_p2), [#allocation4], 4294967040  ;;  %p4157_p9 = pmov %p4156_p2 }
  0xba   : > { %p4158_p11 = pmov %p4156_p2 }
  0xbb   : > { %3346 = dma.done.wait (%p4157_p9), [#allocation7], 16  }
  0xbc   : > { %3348 = vsyncadd (%p4158_p11), [#allocation7], 4294967280  ;;  %s716_s23 = sand.u32 1, %s3572_s20   ;;  %s3788_s9 = sand.u32 1, %s3375_s28  }
  0xbd   : > { %s717_s22 = scalar_lea.sflag [#allocation4], %s716_s23 }
  0xbe   : > { %3350 = dma.done.wait (%p3590_p6), %s717_s22, 112  }
  0xbf   : > { %3352 = vsyncadd (%p3590_p6), %s717_s22, 4294967184  ;;  %s4160_s5 = sld [smem:[#allocation21_spill]]  ;;  %s735_s12 = scalar_lea.vmem [#allocation10], %s3788_s9 }
  0xc0   : > { %s4161_s3 = sld [smem:[#allocation24_spill]]  ;;  %s743_s0 = scalar_lea.vmem [#allocation11], %s3788_s9 }
  0xc1   : > { %s4162_s1 = sld [smem:[#allocation23_spill]]  ;;  %s751_s23 = scalar_lea.vmem [#allocation12], %s3788_s9 }
  0xc2   : > { %s4163_s16 = sld [smem:[#allocation34_spill]]  ;;  %s767_s13 = scalar_lea.vmem [#allocation14], %s3788_s9 }
  0xc3   : > { %s4164_s27 = sld [smem:[#allocation37_spill]] }
  0xc4   : > { %s4165_s22 = sld [smem:[#allocation38_spill]] }
  0xc5   : > { %s4102_s6 = sand.u32 1, %s4160_s5   ;;  %s4166_s2 = sld [smem:[#allocation39_spill]] }
  0xc6   : > { %p868_p0 = scmp.lt.s32.totalorder %s4161_s3, 1  ;;  %s3799_s20 = sshll.u32 %s4102_s6, 3 }
  0xc7   : > { %p872_p7 = scmp.lt.s32.totalorder %s4162_s1, 1  ;;  %s4167_s10 = sld [smem:[#allocation43_spill]] }
  0xc8   : > { %s4205_s3 = smov (!%p868_p0, %s4161_s3), 1  ;;  %s4168_s15 = sld [smem:[#allocation45_spill]] }
  0xc9   : > { %s3804_s18 = scalar_select %p872_p7, %s4162_s1, 1 }
  0xca   : > { %s2625_s19 = sshll.u32 %s4205_s3, 3  ;;  %s867_s14 = scalar_lea.vmem [#allocation15], %s3799_s20 }
  0xcb   : > { %s871_s24 = scalar_lea.vmem %s4163_s16, %s2625_s19  ;;  %s2671_s4 = sshll.u32 %s3804_s18, 5 }
  0xcc   : > { %s3813_s11 = scalar_lea.vmem %s4164_s27, %s2671_s4  ;;  %s3818_s5 = scalar_lea.vmem %s4165_s22, %s2671_s4 }
  0xcd   : > { %s884_s7 = scalar_lea.vmem %s4166_s2, %s3804_s18  ;;  %s3827_s29 = scalar_lea.vmem %s4167_s10, %s2671_s4 }
  0xce   : > { %s2674_s19 = sshll.u32 %s3804_s18, 6  ;;  %s727_s27 = scalar_lea.vmem [#allocation9], %s3788_s9 }
  0xcf   : > { %s3833_s21 = scalar_lea.vmem %s4168_s15, %s2674_s19  ;;  %s759_s22 = scalar_lea.vmem [#allocation13], %s3788_s9 }
  0xd0   : > { %p2634_p6 = scmp.ne.s32.totalorder %s4162_s1, 0 }
  0xd2   : > { %898 = sbr.rel (%p2634_p6) target bundleno = 416 (0x1a0), region = 128 }
  0xd7   : > { %v901_v0 = vld [vmem:[#allocation3 + $0x8] sm:$0xff]  ;;  %v3412_v1 = vmov 0.0   ;;  %v900_v2 = vld [vmem:[#allocation3] sm:$0xff]  ;;  %vm3413_vm0 = vmmov 0   ;;  %v899_v3 = vld [vmem:[%s871_s24] sm:$0xff]  ;;  %vm909_vm1 = vcmask 130048  }
  0xd8   : > { %2721 = vmatprep.subr.mxu0 %v3412_v1  ;;  %2725 = vmatprep.mubr.msk.f32.mxu0 %vm3413_vm0, %v3412_v1  ;;  %v2635_v4 = vld [vmem:[#allocation6] ss:$0 sm:$0xff]  ;;  %vm983_vm2 = vcmask 261120  }
  0xd9   : > { %2722 = vmatpush3.msra.mxu0 %v901_v0 }
  0xda   : > { %2723 = vmatprep.subr.mxu0 %v3412_v1 }
  0xdb   : > { %2724 = vmatpush3.msra.mxu0 %v900_v2 }
  0xdc   : > { %2726 = vmatmul.mubr.msk.f32.vlgmr.msra.gmra.mxu0 %vm909_vm1, %v899_v3 }
 0x19c   : > { %v979_v5 = vpop.f32.mrf.mxu0 }
 0x19d   : > { %v980_v6 = vadd.f32 %v2635_v4, %v979_v5 }
 0x19e   : > { %v2727_v7 = vpop.f32.mrf.mxu0 }
 0x19f   : > { %984 = vst.msk [vmem:[#allocation2] sm:$0xff] %vm983_vm2, %v980_v6 }
 0x1a0 PF: > { %v989_v8 = vld [vmem:[%s3813_s11 + $0x18] sm:$0xff]  ;;  %v3414_v9 = vmov 0.0   ;;  %v988_v10 = vld [vmem:[%s3813_s11 + $0x10] sm:$0xff]  ;;  %vm3415_vm3 = vmmov 0   ;;  %v987_v11 = vld [vmem:[%s3813_s11 + $0x8] sm:$0xff]  ;;  %vm990_vm4 = vcmask 261120  }
 0x1a1   : > { %2728 = vmatprep.subr.mxu0 %v3414_v9  ;;  %2736 = vmatprep.mubr.msk.f32.mxu0 %vm3415_vm3, %v3414_v9  ;;  %v986_v12 = vld [vmem:[%s3813_s11] sm:$0xff]  ;;  %s3416_s2 = smov 120   ;;  %s3417_s8 = smov 96   ;;  %vm1067_vm5 = vcmask 64512   ;;  %v1397_v46 = vld [vmem:[%s3818_s5 + $0x8] sm:$0xff]  ;;  %vm2187_vm6 = vcmask 523264  }
 0x1a2   : > { %2729 = vmatpush3.msra.mxu0 %v989_v8  ;;  %2744 = vmatprep.subr.mxu1 %v3414_v9  ;;  %s3418_s10 = smov 88   ;;  %s3419_s30 = smov 56   ;;  %v1230_v45 = vld [vmem:[%s3818_s5] sm:$0xff] }
 0x1a3   : > { %2730 = vmatprep.subr.mxu0 %v3414_v9  ;;  %2746 = vmatprep.mubr.msk.f32.mxu1 %vm3415_vm3, %v3414_v9  ;;  %s3420_s1 = smov 64   ;;  %s3421_s6 = smov 80  }
 0x1a4   : > { %2731 = vmatpush3.msra.mxu0 %v988_v10  ;;  %s3422_s24 = smov 112   ;;  %s3423_s4 = smov 72   ;;  %v1710_v10 = vld [vmem:[%s3818_s5 + $0x10] sm:$0xff] }
 0x1a5   : > { %2732 = vmatprep.subr.mxu0 %v3414_v9  ;;  %s3424_s11 = smov 104   ;;  %s3425_s3 = smov 48  }
 0x1a6   : > { %2733 = vmatpush3.msra.mxu0 %v987_v11  ;;  %v3855_v13 = vld [vmem:[#allocation2] sm:$0xff]  ;;  %s3426_s19 = smov 40   ;;  %s4170_s15 = scalar_lea.vmem [#allocation8], %s3788_s9 }
 0x1a7   : > { %2734 = vmatprep.subr.mxu0 %v3414_v9 }
 0x1a8   : > { %2735 = vmatpush3.msra.mxu0 %v986_v12 }
 0x1a9   : > { %2737 = vmatmul.mubr.msk.f32.vlgmr.msra.gmra.mxu0 %vm990_vm4, %v3855_v13  ;;  %2739 = vmatprep.subr.mxu0 %v3414_v9 }
 0x1aa   : > { %2741 = vmatprep.mubr.msk.f32.mxu0 %vm3415_vm3, %v3414_v9 }
 0x269   : > { %v3863_v14 = vpop.f32.mrf.mxu0 }
 0x26a   : > { %1231 = vrot.lane.b32.xlu1 %v3863_v14, %s3416_s2  ;;  %1065 = vrot.lane.b32.xlu0 %v3863_v14, %s3417_s8 }
 0x26b   : > { %v2738_v15 = vpop.f32.mrf.mxu0 }
 0x26e   : > { %1233 = vrot.lane.b32.xlu0 %v3863_v14, %s3418_s10 }
 0x2dc   : > { %v1066_v16 = vpop.permute.xlu0 %1065  ;;  %v1232_v18 = vpop.permute.xlu1 %1231 }
 0x2dd   : > { %2740 = vmatpush3.xpose.msk.msra.mxu0 %vm1067_vm5, %v1066_v16 }
 0x2de   : > { %2749 = vmatprep.subr.mxu0 %v3414_v9 }
 0x2e0   : > { %2742 = vmatmul.mubr.msk.f32.vlgmr.msra.gmra.mxu0 %vm1067_vm5, %v3863_v14  ;;  %v1234_v17 = vpop.permute.xlu0 %1233 }
 0x2e1   : > { %2750 = vmatpush3.xpose.msk.msra.mxu0 %vm1067_vm5, %v1234_v17  ;;  %2751 = vmatprep.mubr.msk.f32.mxu0 %vm3415_vm3, %v3414_v9 }
 0x2e2   : > { %2759 = vmatprep.subr.mxu0 %v3414_v9 }
 0x2e4   : > { %2752 = vmatmul.mubr.msk.f32.vlgmr.msra.gmra.mxu0 %vm1067_vm5, %v1232_v18 }
 0x2e5   : > { %2761 = vmatprep.mubr.msk.f32.mxu0 %vm3415_vm3, %v3414_v9  ;;  %2760 = vmatpush3.msra.mxu0 %v1397_v46 }
 0x2e6   : > { %2769 = vmatprep.subr.mxu0 %v3414_v9 }
 0x3a0   : > { %v1138_v19 = vpop.f32.mrf.mxu0 }
 0x3a1   : > { %v1142_v20 = vmul.f32 0.35355338, %v1138_v19 }
 0x3a2   : > { %v2743_v21 = vpop.f32.mrf.mxu0 }
 0x3a3   : > { %v1143_v22 = vsel %vm1067_vm5, %v1142_v20, -inf }
 0x3a4   : > { %1144 = vmax.xlane.f32.xlu1 %v1143_v22  ;;  %v1305_v23 = vpop.f32.mrf.mxu0 }
 0x3a5   : > { %v1309_v24 = vmul.f32 0.35355338, %v1305_v23 }
 0x3a6   : > { %v2753_v25 = vpop.f32.mrf.mxu0 }
 0x3a7   : > { %v1310_v26 = vsel %vm1067_vm5, %v1309_v24, -inf  ;;  %v1951_v25 = vld [vmem:[%s3818_s5 + $0x18] sm:$0xff] }
 0x3a8   : > { %1311 = vmax.xlane.f32.xlu0 %v1310_v26 }
 0x42d   : > { %v1145_v27 = vpop.xlane.xlu1 %1144 }
 0x42e   : > { %v1146_v28 = vsub.f32 %v1142_v20, %v1145_v27 }
 0x430   : > { %v1147_v29 = vmul.f32 1.442695, %v1146_v28 }
 0x431   : > { %v1312_v30 = vpop.xlane.xlu0 %1311 }
 0x432   : > { %2999 = vpow2.f32 %v1147_v29  ;;  %v1313_v31 = vsub.f32 %v1309_v24, %v1312_v30 }
 0x434   : > { %v1314_v32 = vmul.f32 1.442695, %v1313_v31 }
 0x436   : > { %3001 = vpow2.f32 %v1314_v32 }
 0x43f   : > { %v3000_v33 = vpop.eup %2999 }
 0x440   : > { %v1149_v34 = vsel %vm1067_vm5, %v3000_v33, 0.0 }
 0x441   : > { %1150 = vadd.xlane.f32.xlu0 %v1149_v34 }
 0x443   : > { %v3002_v35 = vpop.eup %3001 }
 0x444   : > { %v1316_v36 = vsel %vm1067_vm5, %v3002_v35, 0.0 }
 0x445   : > { %1317 = vadd.xlane.f32.xlu1 %v1316_v36 }
 0x456   : > { %1321 = vrot.lane.b32.xlu1 %v3863_v14, %s3419_s30 }
 0x457   : > { %1154 = vrot.lane.b32.xlu0 %v3863_v14, %s3420_s1 }
 0x45a   : > { %1546 = vrot.lane.b32.xlu1 %v3863_v14, %s3421_s6 }
 0x45b   : > { %1544 = vrot.lane.b32.xlu0 %v3863_v14, %s3422_s24 }
 0x4ca   : > { %v1151_v37 = vpop.xlane.xlu0 %1150 }
 0x4cb   : > { %3003 = vrcp.f32 %v1151_v37 }
 0x4ce   : > { %v1318_v38 = vpop.xlane.xlu1 %1317  ;;  %v1155_v39 = vpop.permute.xlu0 %1154 }
 0x4cf   : > { %3005 = vrcp.f32 %v1318_v38  ;;  %2745 = vmatpush3.msra.mxu1 %v1155_v39 }
 0x4d0   : > { %2754 = vmatprep.subr.mxu1 %v3414_v9 }
 0x4d2   : > { %v1322_v42 = vpop.permute.xlu1 %1321  ;;  %v1545_v52 = vpop.permute.xlu0 %1544 }
 0x4d6   : > { %v1547_v50 = vpop.permute.xlu1 %1546 }
 0x4d8   : > { %v3004_v40 = vpop.eup %3003 }
 0x4d9   : > { %v1153_v41 = vmul.f32 %v3004_v40, %v3000_v33 }
 0x4db   : > { %2747 = vmatmul.mubr.msk.f32.vlgmr.msra.gmra.mxu1 %vm1067_vm5, %v1153_v41 }
 0x4dc   : > { %v3006_v43 = vpop.eup %3005  ;;  %2755 = vmatpush3.msra.mxu1 %v1322_v42  ;;  %2756 = vmatprep.mubr.msk.f32.mxu1 %vm3415_vm3, %v3414_v9 }
 0x4dd   : > { %v1320_v44 = vmul.f32 %v3006_v43, %v3002_v35  ;;  %2764 = vmatprep.subr.mxu1 %v3414_v9 }
 0x4df   : > { %2757 = vmatmul.mubr.msk.f32.vlgmr.msra.gmra.mxu1 %vm1067_vm5, %v1320_v44 }
 0x4e0   : > { %2766 = vmatprep.mubr.msk.f32.mxu1 %vm3415_vm3, %v3414_v9  ;;  %2765 = vmatpush3.msra.mxu1 %v1230_v45 }
 0x4e1   : > { %2774 = vmatprep.subr.mxu1 %v3414_v9 }
 0x59b   : > { %v1226_v47 = vpop.f32.mrf.mxu1 }
 0x59c   : > { %2767 = vmatmul.mubr.msk.f32.vlgmr.msra.gmra.mxu1 %vm1067_vm5, %v1226_v47  ;;  %v2654_v47 = vld [vmem:[%s884_s7] ss:$0 sm:$0xff]  ;;  %s4171_s7 = sld [smem:[#allocation23_spill]] }
 0x59d   : > { %v2748_v48 = vpop.f32.mrf.mxu1  ;;  %2776 = vmatprep.mubr.msk.f32.mxu1 %vm3415_vm3, %v3414_v9 }
 0x59f   : > { %v1393_v49 = vpop.f32.mrf.mxu1 }
 0x5a0   : > { %2762 = vmatmul.mubr.msk.f32.vlgmr.msra.gmra.mxu0 %vm1067_vm5, %v1393_v49  ;;  %v2655_v49 = vld [vmem:[%s4170_s15] ss:$0 sm:$0xff] }
 0x5a1   : > { %2770 = vmatpush3.xpose.msk.msra.mxu0 %vm1067_vm5, %v1547_v50  ;;  %v2758_v51 = vpop.f32.mrf.mxu1  ;;  %2771 = vmatprep.mubr.msk.f32.mxu0 %vm3415_vm3, %v3414_v9 }
 0x5a2   : > { %2779 = vmatprep.subr.mxu0 %v3414_v9  ;;  %p2664_p8 = scmp.ne.s32.totalorder %s4171_s7, 1 }
 0x5a3   : > { %s4172_s9 = sld [smem:[#allocation49_spill]] (!%p2664_p8) }
 0x5a4   : > { %2772 = vmatmul.mubr.msk.f32.vlgmr.msra.gmra.mxu0 %vm1067_vm5, %v1545_v52 }
 0x5a5   : > { %2781 = vmatprep.mubr.msk.f32.mxu0 %vm3415_vm3, %v3414_v9  ;;  %2780 = vmatpush3.msra.mxu0 %v1710_v10  ;;  %v2657_v10 = vld [vmem:[%s735_s12] ss:$0 sm:$0xff] }
 0x5a6   : > { %2789 = vmatprep.subr.mxu0 %v3414_v9 }
 0x65c   : > { %v1540_v53 = vpop.f32.mrf.mxu1 }
 0x65e   : > { %v2768_v54 = vpop.f32.mrf.mxu1 }
 0x660   : > { %v1467_v55 = vpop.f32.mrf.mxu0 }
 0x661   : > { %v3910_v56 = vadd.f32 %v1540_v53, %v1467_v55 }
 0x662   : > { %v2763_v57 = vpop.f32.mrf.mxu0 }
 0x664   : > { %v1618_v58 = vpop.f32.mrf.mxu0 }
 0x665   : > { %v1622_v59 = vmul.f32 0.35355338, %v1618_v58 }
 0x666   : > { %v2773_v60 = vpop.f32.mrf.mxu0 }
 0x667   : > { %v1623_v61 = vsel %vm1067_vm5, %v1622_v59, -inf  ;;  %v2089_v60 = vld [vmem:[%s3827_s29 + $0x10] sm:$0xff] }
 0x668   : > { %1624 = vmax.xlane.f32.xlu1 %v1623_v61  ;;  %v2087_v61 = vld [vmem:[%s3827_s29] sm:$0xff] }
 0x679   : > { %1787 = vrot.lane.b32.xlu1 %v3863_v14, %s3423_s4 }
 0x67d   : > { %1785 = vrot.lane.b32.xlu1 %v3863_v14, %s3424_s11 }
 0x6f1   : > { %v1625_v62 = vpop.xlane.xlu1 %1624 }
 0x6f2   : > { %v1626_v63 = vsub.f32 %v1622_v59, %v1625_v62  ;;  %v2090_v59 = vld [vmem:[%s3827_s29 + $0x18] sm:$0xff] }
 0x6f3   : > { %v2179_v62 = vld [vmem:[%s3833_s21 + $0x38] sm:$0xff] }
 0x6f4   : > { %v1627_v0 = vmul.f32 1.442695, %v1626_v63  ;;  %v2178_v63 = vld [vmem:[%s3833_s21 + $0x30] sm:$0xff] }
 0x6f5   : > { %v1788_v6 = vpop.permute.xlu1 %1787 }
 0x6f6   : > { %3007 = vpow2.f32 %v1627_v0  ;;  %v2177_v0 = vld [vmem:[%s3833_s21 + $0x28] sm:$0xff] }
 0x6f9   : > { %v1786_v8 = vpop.permute.xlu1 %1785 }
 0x703   : > { %v3008_v1 = vpop.eup %3007 }
 0x704   : > { %v1629_v2 = vsel %vm1067_vm5, %v3008_v1, 0.0 }
 0x705   : > { %1630 = vadd.xlane.f32.xlu0 %v1629_v2  ;;  %v2175_v2 = vld [vmem:[%s3833_s21 + $0x18] sm:$0xff] }
 0x71b   : > { %1634 = vrot.lane.b32.xlu0 %v3863_v14, %s3425_s3 }
 0x78e   : > { %v1631_v3 = vpop.xlane.xlu0 %1630 }
 0x78f   : > { %3009 = vrcp.f32 %v1631_v3 }
 0x792   : > { %v1635_v4 = vpop.permute.xlu0 %1634 }
 0x793   : > { %2775 = vmatpush3.msra.mxu1 %v1635_v4 }
 0x794   : > { %2784 = vmatprep.subr.mxu1 %v3414_v9 }
 0x79c   : > { %v3010_v5 = vpop.eup %3009 }
 0x79d   : > { %v1633_v7 = vmul.f32 %v3010_v5, %v3008_v1  ;;  %v2176_v1 = vld [vmem:[%s3833_s21 + $0x20] sm:$0xff] }
 0x79f   : > { %2777 = vmatmul.mubr.msk.f32.vlgmr.msra.gmra.mxu1 %vm1067_vm5, %v1633_v7  ;;  %v2656_v7 = vld [vmem:[%s727_s27] ss:$0 sm:$0xff] }
 0x7a0   : > { %2785 = vmatpush3.xpose.msk.msra.mxu1 %vm1067_vm5, %v1788_v6  ;;  %2786 = vmatprep.mubr.msk.f32.mxu1 %vm3415_vm3, %v3414_v9 }
 0x7a1   : > { %2794 = vmatprep.subr.mxu1 %v3414_v9 }
 0x7a3   : > { %2787 = vmatmul.mubr.msk.f32.vlgmr.msra.gmra.mxu1 %vm1067_vm5, %v1786_v8 }
 0x7a4   : > { %2796 = vmatprep.mubr.msk.f32.mxu1 %vm3415_vm3, %v3414_v9  ;;  %2795 = vmatpush3.msra.mxu1 %v1951_v25 }
 0x7a5   : > { %2810 = vmatprep.subr.mxu1 %v3414_v9 }
 0x85f   : > { %v1706_v11 = vpop.f32.mrf.mxu1 }
 0x860   : > { %2782 = vmatmul.mubr.msk.f32.vlgmr.msra.gmra.mxu0 %vm1067_vm5, %v1706_v11 }
 0x861   : > { %v2778_v12 = vpop.f32.mrf.mxu1  ;;  %2791 = vmatprep.mubr.msk.f32.mxu0 %vm3415_vm3, %v3414_v9 }
 0x863   : > { %v1859_v15 = vpop.f32.mrf.mxu1 }
 0x864   : > { %v1863_v16 = vmul.f32 0.35355338, %v1859_v15  ;;  %v2174_v15 = vld [vmem:[%s3833_s21 + $0x10] sm:$0xff] }
 0x865   : > { %v2788_v17 = vpop.f32.mrf.mxu1 }
 0x866   : > { %v1864_v18 = vsel %vm1067_vm5, %v1863_v16, -inf  ;;  %v2172_v17 = vld [vmem:[%s3833_s21] sm:$0xff] }
 0x867   : > { %1865 = vmax.xlane.f32.xlu0 %v1864_v18  ;;  %v2658_v18 = vld [vmem:[%s743_s0] ss:$0 sm:$0xff] }
 0x87d   : > { %1875 = vrot.lane.b32.xlu0 %v3863_v14, %s3426_s19 }
 0x8f0   : > { %v1866_v19 = vpop.xlane.xlu0 %1865 }
 0x8f1   : > { %v1867_v20 = vsub.f32 %v1863_v16, %v1866_v19  ;;  %v2173_v16 = vld [vmem:[%s3833_s21 + $0x8] sm:$0xff]  ;;  %s4173_s21 = sld [smem:[#allocation50_spill]] (!%p2664_p8) }
 0x8f3   : > { %v1868_v21 = vmul.f32 1.442695, %v1867_v20 }
 0x8f4   : > { %v1876_v22 = vpop.permute.xlu0 %1875 }
 0x8f5   : > { %3011 = vpow2.f32 %v1868_v21  ;;  %2790 = vmatpush3.msra.mxu0 %v1876_v22 }
 0x8f6   : > { %2799 = vmatprep.subr.mxu0 %v3414_v9 }
 0x902   : > { %v3012_v23 = vpop.eup %3011 }
 0x903   : > { %v1870_v24 = vsel %vm1067_vm5, %v3012_v23, 0.0 }
 0x904   : > { %1871 = vadd.xlane.f32.xlu1 %v1870_v24 }
 0x920   : > { %v1780_v26 = vpop.f32.mrf.mxu0 }
 0x921   : > { %v1784_v27 = vadd.f32 %v1780_v26, %v3910_v56 }
 0x922   : > { %v2783_v14 = vpop.f32.mrf.mxu0 }
 0x98d   : > { %v1872_v28 = vpop.xlane.xlu1 %1871 }
 0x98e   : > { %3013 = vrcp.f32 %v1872_v28 }
 0x99b   : > { %v3014_v29 = vpop.eup %3013 }
 0x99c   : > { %v1874_v30 = vmul.f32 %v3014_v29, %v3012_v23  ;;  %v2660_v23 = vld [vmem:[%s751_s23] ss:$0 sm:$0xff] }
 0x99e   : > { %2792 = vmatmul.mubr.msk.f32.vlgmr.msra.gmra.mxu0 %vm1067_vm5, %v1874_v30 }
 0x99f   : > { %2807 = vmatprep.mubr.msk.f32.mxu0 %vm3415_vm3, %v3414_v9  ;;  %2800 = vmatpush3.msra.mxu0 %v2090_v59 }
 0x9a0   : > { %2801 = vmatprep.subr.mxu0 %v3414_v9 }
 0x9a1   : > { %2802 = vmatpush3.msra.mxu0 %v2089_v60 }
 0x9a2   : > { %2803 = vmatprep.subr.mxu0 %v3414_v9 }
 0xa5e   : > { %v1947_v31 = vpop.f32.mrf.mxu0 }
 0xa5f   : > { %2797 = vmatmul.mubr.msk.f32.vlgmr.msra.gmra.mxu1 %vm1067_vm5, %v1947_v31 }
 0xa60   : > { %v2793_v32 = vpop.f32.mrf.mxu0  ;;  %2826 = vmatprep.mubr.msk.f32.mxu1 %vm3415_vm3, %v3414_v9  ;;  %2811 = vmatpush3.msra.mxu1 %v2179_v62 }
 0xa61   : > { %2812 = vmatprep.subr.mxu1 %v3414_v9 }
 0xa62   : > { %2813 = vmatpush3.msra.mxu1 %v2178_v63 }
 0xa63   : > { %2814 = vmatprep.subr.mxu1 %v3414_v9 }
 0xa64   : > { %2815 = vmatpush3.msra.mxu1 %v2177_v0 }
 0xa65   : > { %2816 = vmatprep.subr.mxu1 %v3414_v9 }
 0xa66   : > { %2817 = vmatpush3.msra.mxu1 %v2176_v1 }
 0xa67   : > { %2818 = vmatprep.subr.mxu1 %v3414_v9 }
 0xa68   : > { %2819 = vmatpush3.msra.mxu1 %v2175_v2 }
 0xa69   : > { %2820 = vmatprep.subr.mxu1 %v3414_v9 }
 0xa6a   : > { %2821 = vmatpush3.msra.mxu1 %v2174_v15 }
 0xa6b   : > { %2822 = vmatprep.subr.mxu1 %v3414_v9 }
 0xa6c   : > { %2823 = vmatpush3.msra.mxu1 %v2173_v16 }
 0xa6d   : > { %2824 = vmatprep.subr.mxu1 %v3414_v9 }
 0xa6e   : > { %2825 = vmatpush3.msra.mxu1 %v2172_v17 }
 0xb1f   : > { %v2021_v33 = vpop.f32.mrf.mxu1 }
 0xb20   : > { %v2025_v34 = vadd.f32 %v2021_v33, %v1784_v27 }
 0xb21   : > { %v2798_v35 = vpop.f32.mrf.mxu1 }
 0xb22   : > { %v2026_v36 = vadd.f32 %v2025_v34, %v3855_v13 }
 0xb24   : > { %v2029_v37 = vsel %vm990_vm4, %v2026_v36, 0.0 }
 0xb25   : > { %2030 = vadd.xlane.f32.xlu1 %v2029_v37 }
 0xbae   : > { %v2031_v38 = vpop.xlane.xlu1 %2030 }
 0xbaf   : > { %v2033_v39 = vmul.f32 0.03125, %v2031_v38  ;;  %v2663_v38 = vld [vmem:[%s767_s13] ss:$0 sm:$0xff] }
 0xbb1   : > { %v2034_v40 = vsub.f32 %v2026_v36, %v2033_v39  ;;  %v2662_v36 = vld [vmem:[%s759_s22] ss:$0 sm:$0xff] }
 0xbb3   : > { %v2035_v41 = vmul.f32 %v2034_v40, %v2034_v40 }
 0xbb5   : > { %v2036_v42 = vsel %vm990_vm4, %v2035_v41, 0.0 }
 0xbb6   : > { %2037 = vadd.xlane.f32.xlu1 %v2036_v42 }
 0xc3f   : > { %v2038_v43 = vpop.xlane.xlu1 %2037 }
 0xc40   : > { %v2039_v44 = vmul.f32 0.03125, %v2038_v43 }
 0xc42   : > { %v2040_v45 = vadd.f32 1e-06, %v2039_v44 }
 0xc44   : > { %3015 = vrsqrt.f32 %v2040_v45 }
 0xc51   : > { %v3016_v46 = vpop.eup %3015 }
 0xc52   : > { %v2042_v48 = vmul.f32 %v3016_v46, %v2034_v40 }
 0xc54   : > { %v2049_v50 = vmul.f32 %v2654_v47, %v2042_v48 }
 0xc56   : > { %v2056_v51 = vadd.f32 %v2655_v49, %v2049_v50 }
 0xc58   : > { %v2057_v52 = vadd.f32 %v2056_v51, %v3855_v13  ;;  %v2088_v13 = vld [vmem:[%s3827_s29 + $0x8] sm:$0xff] }
 0xc59   : > { %2804 = vmatpush3.msra.mxu0 %v2088_v13 }
 0xc5a   : > { %v2060_v53 = vsel %vm990_vm4, %v2057_v52, 0.0  ;;  %2805 = vmatprep.subr.mxu0 %v3414_v9 }
 0xc5b   : > { %2061 = vadd.xlane.f32.xlu1 %v2060_v53  ;;  %2806 = vmatpush3.msra.mxu0 %v2087_v61 }
 0xce4   : > { %v2062_v54 = vpop.xlane.xlu1 %2061 }
 0xce5   : > { %v2063_v55 = vmul.f32 0.03125, %v2062_v54 }
 0xce7   : > { %v2064_v56 = vsub.f32 %v2057_v52, %v2063_v55 }
 0xce9   : > { %v2065_v57 = vmul.f32 %v2064_v56, %v2064_v56 }
 0xceb   : > { %v2066_v58 = vsel %vm990_vm4, %v2065_v57, 0.0 }
 0xcec   : > { %2067 = vadd.xlane.f32.xlu1 %v2066_v58 }
 0xd75   : > { %v2068_v3 = vpop.xlane.xlu1 %2067 }
 0xd76   : > { %v2069_v4 = vmul.f32 0.03125, %v2068_v3 }
 0xd78   : > { %v2070_v5 = vadd.f32 1e-05, %v2069_v4 }
 0xd7a   : > { %3017 = vrsqrt.f32 %v2070_v5 }
 0xd87   : > { %v3018_v6 = vpop.eup %3017 }
 0xd88   : > { %v2072_v8 = vmul.f32 %v3018_v6, %v2064_v56 }
 0xd8a   : > { %v2079_v11 = vmul.f32 %v2656_v7, %v2072_v8 }
 0xd8c   : > { %v2086_v12 = vadd.f32 %v2657_v10, %v2079_v11 }
 0xd8e   : > { %2808 = vmatmul.mubr.msk.f32.vlgmr.msra.gmra.mxu0 %vm990_vm4, %v2086_v12 }
 0xe4e   : > { %v2167_v19 = vpop.f32.mrf.mxu0 }
 0xe4f   : > { %v2168_v20 = vadd.f32 %v2658_v18, %v2167_v19 }
 0xe50   : > { %v2809_v21 = vpop.f32.mrf.mxu0 }
 0xe51   : > { %v2171_v22 = vmax.f32 %v2168_v20, 0.0 }
 0xe53   : > { %2827 = vmatmul.mubr.msk.f32.vlgmr.msra.gmra.mxu1 %vm2187_vm6, %v2171_v22 }
 0xf13   : > { %v2257_v24 = vpop.f32.mrf.mxu1 }
 0xf14   : > { %v2258_v25 = vadd.f32 %v2660_v23, %v2257_v24 }
 0xf15   : > { %v2828_v26 = vpop.f32.mrf.mxu1 }
 0xf16   : > { %v2261_v27 = vadd.f32 %v2258_v25, %v2086_v12 }
 0xf18   : > { %v2264_v14 = vsel %vm990_vm4, %v2261_v27, 0.0 }
 0xf19   : > { %2265 = vadd.xlane.f32.xlu1 %v2264_v14 }
 0xfa2   : > { %v2266_v9 = vpop.xlane.xlu1 %2265 }
 0xfa3   : > { %v2267_v28 = vmul.f32 0.03125, %v2266_v9 }
 0xfa5   : > { %v2268_v29 = vsub.f32 %v2261_v27, %v2267_v28 }
 0xfa7   : > { %v2269_v30 = vmul.f32 %v2268_v29, %v2268_v29 }
 0xfa9   : > { %v2270_v31 = vsel %vm990_vm4, %v2269_v30, 0.0 }
 0xfaa   : > { %2271 = vadd.xlane.f32.xlu0 %v2270_v31 }
0x1033   : > { %v2272_v32 = vpop.xlane.xlu0 %2271 }
0x1034   : > { %v2273_v33 = vmul.f32 0.03125, %v2272_v32 }
0x1036   : > { %v2274_v34 = vadd.f32 1e-05, %v2273_v33 }
0x1038   : > { %3019 = vrsqrt.f32 %v2274_v34 }
0x1045   : > { %v3020_v35 = vpop.eup %3019 }
0x1046   : > { %v2276_v37 = vmul.f32 %v3020_v35, %v2268_v29 }
0x1048   : > { %v2283_v39 = vmul.f32 %v2662_v36, %v2276_v37  ;;  %2295 = sbr.rel (%p2664_p8) target bundleno = 4482 (0x1182), region = 132 }
0x104a   : > { %v2290_v40 = vadd.f32 %v2663_v38, %v2283_v39 }
0x104c   : > { %2291 = vst.msk [vmem:[#allocation2] sm:$0xff] %vm990_vm4, %v2290_v40 }
0x104d   : > { %v2298_v41 = vsel %vm990_vm4, %v2290_v40, 0.0  ;;  %v2665_v51 = vld [vmem:[%s4172_s9] ss:$0 sm:$0xff] }
0x104e   : > { %2299 = vadd.xlane.f32.xlu0 %v2298_v41  ;;  %v2666_v53 = vld [vmem:[%s4173_s21] ss:$0 sm:$0xff] }
0x10d7   : > { %v2300_v42 = vpop.xlane.xlu0 %2299 }
0x10d8   : > { %v2301_v43 = vmul.f32 0.03125, %v2300_v42 }
0x10da   : > { %v2302_v44 = vsub.f32 %v2290_v40, %v2301_v43 }
0x10dc   : > { %v2303_v45 = vmul.f32 %v2302_v44, %v2302_v44 }
0x10de   : > { %v2304_v46 = vsel %vm990_vm4, %v2303_v45, 0.0 }
0x10df   : > { %2305 = vadd.xlane.f32.xlu0 %v2304_v46 }
0x1168   : > { %v2306_v47 = vpop.xlane.xlu0 %2305 }
0x1169   : > { %v2307_v48 = vmul.f32 0.03125, %v2306_v47 }
0x116b   : > { %v2308_v49 = vadd.f32 1e-05, %v2307_v48 }
0x116d   : > { %3021 = vrsqrt.f32 %v2308_v49 }
0x117a   : > { %v3022_v50 = vpop.eup %3021 }
0x117b   : > { %v2310_v52 = vmul.f32 %v3022_v50, %v2302_v44 }
0x117d   : > { %v2317_v54 = vmul.f32 %v2665_v51, %v2310_v52 }
0x117f   : > { %v2324_v55 = vadd.f32 %v2666_v53, %v2317_v54 }
0x1181   : > { %2325 = vst.msk [vmem:[%s867_s14] sm:$0xff] %vm990_vm4, %v2324_v55 }
0x1182 PF: > { %s4174_s27 = sld [smem:[#allocation24_spill]]  ;;  %s2340_s1 = sshll.u32 %s867_s14, 4  ;;  %s2341_s1 = int_to_ptr.vmem [resolvable:$true] %s2340_s1 }
0x1183   : > { %s4175_s0 = sld [smem:[#allocation21_spill]]  ;;  %s3271_s4 = scalar_lea.vmem %s2341_s1, 128 }
0x1184   : > { %s4176_s23 = sld [smem:[#allocation29_spill]]  ;;  %p3272_p13 = scmp.ne.s32.totalorder %s2341_s1, %s3271_s4 }
0x1185   : > { %s4177_s10 = sld [smem:[#allocation51_spill]]  ;;  %s3427_s11 = smov [#allocation15]  }
0x1186   : > { %s3275_s3 = sshll.u32 %s3427_s11, 4  ;;  %s3276_s3 = int_to_ptr.vmem [resolvable:$false] %s3275_s3 }
0x1187   : > { %s3277_s19 = scalar_lea.vmem %s3276_s3, 256  ;;  %p3278_p4 = scmp.lt.s32.totalorder %s2341_s1, %s3276_s3 }
0x1188   : > { %s2668_s22 = sshll.u32 %s4174_s27, 7  ;;  %p3279_p5 = scmp.lt.s32.totalorder %s3277_s19, %s3271_s4 }
0x1189   : > { %s4178_s6 = sand.u32 1, %s4175_s0  }
0x118a   : > { %s2327_s24 = scalar_lea.sflag [#allocation5], %s4178_s6  ;;  %p4179_p12 = scmp.ne.s32.totalorder %s4176_s23, 0 }
0x118b   : > { %s2338_s30 = scalar_lea.hbm %s4177_s10, %s2668_s22  ;;  %p3280_p10 = por %p3279_p5, %p3278_p4 }
0x118c   : > { %p3273_p1 = pnand %p3272_p13, %p4179_p12 }
0x118e   : > { %p3274_p3 = pneg %p3273_p1 }
0x1190   : > { %p3281_p2 = pnand %p3280_p10, %p3274_p3 }
0x1192   : > { %3284 = shalt.err (!%p3281_p2)
}
0x1193   : > { %s3285_s5 = scalar_lea.hbm %s2338_s30, 128  ;;  %s3289_s17 = scalar_lea.hbm %s4177_s10, 256 }
0x1194   : > { %p3286_p9 = scmp.ne.s32.totalorder %s2338_s30, %s3285_s5  ;;  %p3290_p7 = scmp.lt.s32.totalorder %s2338_s30, %s4177_s10 }
0x1195   : > { %p3291_p6 = scmp.lt.s32.totalorder %s3289_s17, %s3285_s5 }
0x1196   : > { %p3287_p11 = pnand %p3286_p9, %p4179_p12 }
0x1197   : > { %p3292_p8 = por %p3291_p6, %p3290_p7 }
0x1198   : > { %p3288_p0 = pneg %p3287_p11 }
0x119a   : > { %p3293_p13 = pnand %p3292_p8, %p3288_p0 }
0x119c   : > { %3296 = shalt.err (!%p3293_p13)
}
0x119d   : > { %2851 = dma.vmem_to_hbm [thread:$0]  (%p4179_p12), %s2341_s1, 128, %s2338_s30, %s2327_s24  }
0x119e PF: > { %s4180_s7 = sld [smem:[#allocation27_spill]] }
0x119f   : > { %s4181_s12 = sld [smem:[#allocation20_spill]] }
0x11a0   : > { %s4182_s13 = sld [smem:[#allocation30_spill]] }
0x11a4   : > { %p2891_p1 = scmp.ge.s32.totalorder %s4180_s7, 2 }
0x11a5   : > { %s2352_s9 = sand.u32 1, %s4181_s12  }
0x11a6   : > { %p4183_p3 = scmp.ne.s32.totalorder %s4182_s13, 0  ;;  %s2353_s18 = scalar_lea.sflag [#allocation5], %s2352_s9 }
0x11a8   : > { %p2883_p4 = pnand %p2891_p1, %p4183_p3 }
0x11aa   : > { %p2884_p5 = pneg %p2883_p4 }
0x11ac   : > { %3354 = dma.done.wait (%p2884_p5), %s2353_s18, 128  }
0x11ad   : > { %3356 = vsyncadd (%p2884_p5), %s2353_s18, 4294967168  ;;  %s32_s1 = sadd.s32 1, %s4180_s7   ;;  %s4184_s24 = sld [smem:[#allocation21_spill]] }
0x11ae   : > { %p29_p10 = scmp.ge.s32.totalorder %s32_s1, 6   ;;  %s4185_s29 = smov %s3686_s25 }
0x11af   : > { %s4186_s21 = sld [smem:[#allocation22_spill]]  ;;  %s4192_s25 = smov %s3367_s26 }
0x11b0   : > { %s4187_s0 = sld [smem:[#allocation33_spill]]  ;;  %s4193_s26 = smov %s4185_s29 }
0x11b1   : > { %s4188_s23 = sld [smem:[#allocation25_spill]]  ;;  %s4194_s27 = smov %s3375_s28 }
0x11b2   : > { %s4189_s30 = sld [smem:[#allocation26_spill]] }
0x11b3   : > { %s4190_s18 = sld [smem:[#allocation31_spill]]  ;;  %31 = sbr.rel (!%p29_p10) target bundleno = 28 (0x1c), region = 232 }
0x11b4   : > { %s4191_s19 = sld [smem:[#allocation32_spill]] }
0x11b5   : > { %s4195_s28 = smov %s4186_s21 }
0x11b6   : > { %s4196_s29 = smov %s4187_s0 }
0x11b7   : > { %s4197_s0 = smov %s4188_s23 }
0x11b8   :  { %2358 = vsyncpa [#allocation4], 1 }
0x11b9   :  { %2360 = vsyncpa [#allocation4 + $0x1], 1 }
0x11ba   :  { %2361 = vsyncpa [#allocation7], 1 }
0x11bb   :  { %2362 = vsyncpa [#allocation5], 1 }
0x11bc   :  { %2364 = vsyncpa [#allocation5 + $0x1], 1 }

</bundles_post_ra>
